<compile_context>
chip_gen: v7x
topology: tpu7x:2x2x1
jax: 0.10.0
libtpu: 0.0.40
codegen_flags: <defaults>
</compile_context>

<pallas_src>
import functools

import jax
import jax.numpy as jnp
from jax.experimental import pallas as pl
from jax.experimental.pallas import tpu as pltpu

F = 512              # width of every Linear in the module
N_LAYERS = 5         # 5 Linear layers per branch (BN folded in)
RELU_LAYERS = (0, 1, 3)
MAX_TILE_B = 512     # batch-tile cap (VMEM-safe on v5e / v6e / v7x)


def _round_up(n, m):
    return ((n + m - 1) // m) * m


def _choose_tile(b):
    """Smallest 8-multiple tile such that padding never nearly doubles B."""
    n_tiles = -(-b // MAX_TILE_B)
    return _round_up(-(-b // n_tiles), 8)


# ----------------------------------------------------------------------------
# Kernel: 5-layer MLP chain (BN folded), optional per-branch residual.
#   grid = (branch, batch_tile); weights/biases indexed only by branch.
# ----------------------------------------------------------------------------
def _adaptor_kernel(x_ref, w_ref, b_ref, o_ref, *, residual_flags):
    x = x_ref[...]                          # (tile_b, F) f32
    biases = b_ref[...]                     # (N_LAYERS, F) f32

    h = x
    for l in range(N_LAYERS):
        # bf16 x bf16 MXU matmul with f32 accumulation.
        h = jnp.dot(h.astype(jnp.bfloat16), w_ref[l],
                    preferred_element_type=jnp.float32)
        h = h + biases[l][None, :]          # Linear bias + folded BN shift
        if l in RELU_LAYERS:
            h = jnp.maximum(h, 0.0)

    # img branch: img_mu = x + mlp(x).  Branch selection resolved statically
    # when possible; otherwise via pl.program_id on the branch grid axis.
    if all(residual_flags):
        h = h + x
    elif any(residual_flags):
        mask = jnp.float32(0.0)
        for idx, flag in enumerate(residual_flags):
            if flag:
                mask = mask + (pl.program_id(0) == idx).astype(jnp.float32)
        h = h + mask * x

    o_ref[...] = h.astype(o_ref.dtype)


# ----------------------------------------------------------------------------
# pallas_call wrapper: fused branch+batch grid, resident packed weights.
# ----------------------------------------------------------------------------
def _run_fused(x, w, b, residual_flags, tile_b):
    n_branch, b_pad, f = x.shape
    assert f == F and b_pad % tile_b == 0
    grid = (n_branch, b_pad // tile_b)

    kernel = functools.partial(_adaptor_kernel,
                               residual_flags=tuple(residual_flags))

    flops = 2 * n_branch * b_pad * F * F * N_LAYERS
    bytes_accessed = (int(x.size) * x.dtype.itemsize          # input
                      + int(x.size) * 4                        # f32 output
                      + int(w.size) * w.dtype.itemsize
                      + int(b.size) * b.dtype.itemsize)

    return pl.pallas_call(
        kernel,
        out_shape=jax.ShapeDtypeStruct((n_branch, b_pad, F), jnp.float32),
        grid_spec=pltpu.PrefetchScalarGridSpec(
            num_scalar_prefetch=0,
            grid=grid,
            in_specs=[
                # activations: tiled over (branch, batch)
                pl.BlockSpec((None, tile_b, F), lambda i, j: (i, j, 0)),
                # packed weights: one block per branch, resident across batch
                pl.BlockSpec((None, N_LAYERS, F, F), lambda i, j: (i, 0, 0, 0)),
                # packed biases: one block per branch, resident across batch
                pl.BlockSpec((None, N_LAYERS, F), lambda i, j: (i, 0, 0)),
            ],
            out_specs=pl.BlockSpec((None, tile_b, F), lambda i, j: (i, j, 0)),
        ),
        compiler_params=pltpu.CompilerParams(
            # branch axis parallel (v7x megacore: one branch per core);
            # batch axis sequential so weights are not duplicated per core.
            dimension_semantics=("parallel", "arbitrary"),
            vmem_limit_bytes=32 * 1024 * 1024),
        cost_estimate=pl.CostEstimate(
            flops=flops, transcendentals=0, bytes_accessed=bytes_accessed),
    )(x, w, b)


# ----------------------------------------------------------------------------
# Deterministic parameter construction (synthetic, no checkpoint)
# ----------------------------------------------------------------------------
def _linear_params(key):
    kw, kb = jax.random.split(key)
    # Stored as (in, out) == transpose of PyTorch's (out, in) Linear weight.
    w = jax.random.normal(kw, (F, F), jnp.float32) * 0.02
    b = jax.random.normal(kb, (F,), jnp.float32) * 0.01
    return w, b


def _bn_params(key, eps=1e-5):
    k1, k2, k3, k4 = jax.random.split(key, 4)
    gamma = 1.0 + 0.1 * jax.random.normal(k1, (F,), jnp.float32)
    beta = 0.05 * jax.random.normal(k2, (F,), jnp.float32)
    run_mean = 0.01 * jax.random.normal(k3, (F,), jnp.float32)
    run_var = jnp.abs(1.0 + 0.1 * jax.random.normal(k4, (F,), jnp.float32))
    scale = gamma / jnp.sqrt(run_var + eps)   # inference-mode BN
    shift = beta - run_mean * scale
    return scale, shift


def _make_branch_params(key):
    """Returns (weights (5,F,F) bf16, biases (5,F) f32), BN folded in."""
    keys = jax.random.split(key, 8)
    layer_keys = [(keys[0], keys[1]),   # Linear + BN (+ReLU)
                  (keys[2], keys[3]),   # Linear + BN (+Dropout) (+ReLU)
                  (keys[4], None),      # Linear
                  (keys[5], keys[6]),   # Linear + BN (+ReLU)
                  (keys[7], None)]      # Linear
    ws, bs = [], []
    for k_lin, k_bn in layer_keys:
        w, b = _linear_params(k_lin)
        if k_bn is not None:
            scale, shift = _bn_params(k_bn)
            # (x@W + b)*scale + shift == x@(W*scale) + (b*scale + shift)
            w = w * scale[None, :]
            b = b * scale + shift
        ws.append(w)
        bs.append(b)
    return jnp.stack(ws).astype(jnp.bfloat16), jnp.stack(bs)


def make_params(key):
    k_txt, k_img = jax.random.split(key)
    w_txt, b_txt = _make_branch_params(k_txt)
    w_img, b_img = _make_branch_params(k_img)
    # Row 0 = txt branch, row 1 = img branch.
    return {"w": jnp.stack([w_txt, w_img]),    # (2, 5, F, F) bf16
            "b": jnp.stack([b_txt, b_img])}    # (2, 5, F)    f32


# ----------------------------------------------------------------------------
# Forward (mirrors AsymProbAdaptor.forward, inference mode)
# ----------------------------------------------------------------------------
def asym_prob_adaptor_forward(params, xfT=None, xfI=None):
    txt_mu = txt_log_var = img_mu = None

    branches = []   # (param_row, x_f32, residual_flag, original_batch)
    if xfT is not None:
        txt_mu = xfT
        branches.append((0, xfT.astype(jnp.float32), False, xfT.shape[0]))
    if xfI is not None:
        # xfI.half(): fp16 rounding applied at the branch input boundary.
        x_img = xfI.astype(jnp.float16).astype(jnp.float32)
        branches.append((1, x_img, True, xfI.shape[0]))
    if not branches:
        return txt_mu, txt_log_var, img_mu

    rows = [r for r, _, _, _ in branches]
    residual_flags = [flag for _, _, flag, _ in branches]

    b_max = max(b for _, _, _, b in branches)
    tile = _choose_tile(b_max)
    b_pad = _round_up(b_max, tile)

    x_stack = jnp.stack(
        [jnp.pad(x, ((0, b_pad - x.shape[0]), (0, 0))) for _, x, _, _ in branches])

    # Static contiguous row selection of the pre-stacked params.
    w = params["w"][rows[0]:rows[-1] + 1]
    b = params["b"][rows[0]:rows[-1] + 1]

    out = _run_fused(x_stack, w, b, residual_flags, tile)   # (n, b_pad, F) f32

    for pos, (row, _, _, bsz) in enumerate(branches):
        branch_out = out[pos, :bsz]
        if row == 0:
            txt_log_var = branch_out
        else:
            img_mu = branch_out.astype(jnp.float16)

    return txt_mu, txt_log_var, img_mu


# ----------------------------------------------------------------------------
# Pure-JAX reference (identical bf16-weight math) for numerical sanity.
# ----------------------------------------------------------------------------
def _reference_branch(w, b, x, residual):
    h = x
    for l in range(N_LAYERS):
        h = jnp.dot(h.astype(jnp.bfloat16), w[l],
                    preferred_element_type=jnp.float32) + b[l][None, :]
        if l in RELU_LAYERS:
            h = jnp.maximum(h, 0.0)
    return h + x if residual else h


# ----------------------------------------------------------------------------
if __name__ == "__main__":
    key = jax.random.PRNGKey(0)
    k_params, k_txt, k_img = jax.random.split(key, 3)

    params = make_params(k_params)

    B = 8
    xfT = jax.random.normal(k_txt, (B, F), jnp.float32)
    xfI = jax.random.normal(k_img, (B, F), jnp.float32)

    fwd = jax.jit(asym_prob_adaptor_forward)
    txt_mu, txt_log_var, img_mu = fwd(params, xfT, xfI)
    jax.block_until_ready((txt_mu, txt_log_var, img_mu))

    assert txt_mu.shape == (B, F) and txt_mu.dtype == jnp.float32
    assert txt_log_var.shape == (B, F) and txt_log_var.dtype == jnp.float32
    assert img_mu.shape == (B, F) and img_mu.dtype == jnp.float16

    ref_txt = _reference_branch(params["w"][0], params["b"][0],
                                xfT.astype(jnp.float32), residual=False)
    x_img_ref = xfI.astype(jnp.float16).astype(jnp.float32)
    ref_img = _reference_branch(params["w"][1], params["b"][1],
                                x_img_ref, residual=True).astype(jnp.float16)

    assert bool(jnp.all(jnp.isfinite(txt_log_var)))
    assert bool(jnp.all(jnp.isfinite(img_mu.astype(jnp.float32))))
    assert jnp.allclose(txt_log_var, ref_txt, rtol=5e-3, atol=5e-3)
    assert jnp.allclose(img_mu.astype(jnp.float32), ref_img.astype(jnp.float32),
                        rtol=5e-3, atol=5e-3)

    print("KERNEL_OK")
</pallas_src>

<mosaic_0001>
module attributes {stable_mosaic.version = 11 : i64} {
  func.func @_adaptor_kernel(%arg0: i32, %arg1: i32, %arg2: memref<1x8x512xf32, #tpu.memory_space<vmem>>, %arg3: memref<1x5x512x512xbf16, #tpu.memory_space<vmem>>, %arg4: memref<1x5x512xf32, #tpu.memory_space<vmem>>, %arg5: memref<1x8x512xf32, #tpu.memory_space<vmem>>) attributes {dimension_semantics = [#tpu.dimension_semantics<parallel>, #tpu.dimension_semantics<arbitrary>], iteration_bounds = array<i64: 2, 1>, scalar_prefetch = 0 : i64, scratch_operands = 0 : i64, tpu.core_type = #tpu.core_type<tc>, window_params = [{transform_indices = @transform_0, window_bounds = array<i64: 1, 8, 512>}, {transform_indices = @transform_1, window_bounds = array<i64: 1, 5, 512, 512>}, {transform_indices = @transform_2, window_bounds = array<i64: 1, 5, 512>}, {transform_indices = @transform_3, window_bounds = array<i64: 1, 8, 512>}]} {
    %c0 = arith.constant 0 : index
    %c0_0 = arith.constant 0 : index
    %c0_1 = arith.constant 0 : index
    %0 = vector.load %arg2[%c0, %c0_0, %c0_1] : memref<1x8x512xf32, #tpu.memory_space<vmem>>, vector<1x8x512xf32>
    %1 = vector.shape_cast %0 : vector<1x8x512xf32> to vector<8x512xf32>
    %c0_2 = arith.constant 0 : index
    %c0_3 = arith.constant 0 : index
    %c0_4 = arith.constant 0 : index
    %2 = vector.load %arg4[%c0_2, %c0_3, %c0_4] : memref<1x5x512xf32, #tpu.memory_space<vmem>>, vector<1x5x512xf32>
    %3 = vector.shape_cast %2 : vector<1x5x512xf32> to vector<5x512xf32>
    %4 = arith.truncf %1 : vector<8x512xf32> to vector<8x512xbf16>
    %c0_5 = arith.constant 0 : index
    %c0_6 = arith.constant 0 : index
    %c0_7 = arith.constant 0 : index
    %c0_8 = arith.constant 0 : index
    %5 = vector.load %arg3[%c0_5, %c0_6, %c0_7, %c0_8] : memref<1x5x512x512xbf16, #tpu.memory_space<vmem>>, vector<1x1x512x512xbf16>
    %6 = vector.shape_cast %5 : vector<1x1x512x512xbf16> to vector<512x512xbf16>
    %cst = arith.constant dense<0.000000e+00> : vector<8x512xf32>
    %7 = tpu.matmul %4, %6, %cst {dimension_numbers = #tpu.dot_dimension_numbers<[1], [0], [0], [1], [0, 0, 1, 1], [], []>} : vector<8x512xbf16>, vector<512x512xbf16>, vector<8x512xf32> -> vector<8x512xf32>
    %8 = vector.extract_strided_slice %3 {offsets = [0, 0], sizes = [1, 512], strides = [1, 1]} : vector<5x512xf32> to vector<1x512xf32>
    %9 = vector.shape_cast %8 : vector<1x512xf32> to vector<512xf32>
    %10 = vector.shape_cast %9 : vector<512xf32> to vector<1x512xf32>
    %11 = vector.broadcast %10 : vector<1x512xf32> to vector<8x512xf32>
    %12 = arith.addf %7, %11 : vector<8x512xf32>
    %cst_9 = arith.constant 0.000000e+00 : f32
    %13 = vector.broadcast %cst_9 : f32 to vector<8x512xf32>
    %14 = arith.maximumf %12, %13 : vector<8x512xf32>
    %15 = arith.truncf %14 : vector<8x512xf32> to vector<8x512xbf16>
    %c0_10 = arith.constant 0 : index
    %c1 = arith.constant 1 : index
    %c0_11 = arith.constant 0 : index
    %c0_12 = arith.constant 0 : index
    %16 = vector.load %arg3[%c0_10, %c1, %c0_11, %c0_12] : memref<1x5x512x512xbf16, #tpu.memory_space<vmem>>, vector<1x1x512x512xbf16>
    %17 = vector.shape_cast %16 : vector<1x1x512x512xbf16> to vector<512x512xbf16>
    %cst_13 = arith.constant dense<0.000000e+00> : vector<8x512xf32>
    %18 = tpu.matmul %15, %17, %cst_13 {dimension_numbers = #tpu.dot_dimension_numbers<[1], [0], [0], [1], [0, 0, 1, 1], [], []>} : vector<8x512xbf16>, vector<512x512xbf16>, vector<8x512xf32> -> vector<8x512xf32>
    %19 = vector.extract_strided_slice %3 {offsets = [1, 0], sizes = [1, 512], strides = [1, 1]} : vector<5x512xf32> to vector<1x512xf32>
    %20 = vector.shape_cast %19 : vector<1x512xf32> to vector<512xf32>
    %21 = vector.shape_cast %20 : vector<512xf32> to vector<1x512xf32>
    %22 = vector.broadcast %21 : vector<1x512xf32> to vector<8x512xf32>
    %23 = arith.addf %18, %22 : vector<8x512xf32>
    %cst_14 = arith.constant 0.000000e+00 : f32
    %24 = vector.broadcast %cst_14 : f32 to vector<8x512xf32>
    %25 = arith.maximumf %23, %24 : vector<8x512xf32>
    %26 = arith.truncf %25 : vector<8x512xf32> to vector<8x512xbf16>
    %c0_15 = arith.constant 0 : index
    %c2 = arith.constant 2 : index
    %c0_16 = arith.constant 0 : index
    %c0_17 = arith.constant 0 : index
    %27 = vector.load %arg3[%c0_15, %c2, %c0_16, %c0_17] : memref<1x5x512x512xbf16, #tpu.memory_space<vmem>>, vector<1x1x512x512xbf16>
    %28 = vector.shape_cast %27 : vector<1x1x512x512xbf16> to vector<512x512xbf16>
    %cst_18 = arith.constant dense<0.000000e+00> : vector<8x512xf32>
    %29 = tpu.matmul %26, %28, %cst_18 {dimension_numbers = #tpu.dot_dimension_numbers<[1], [0], [0], [1], [0, 0, 1, 1], [], []>} : vector<8x512xbf16>, vector<512x512xbf16>, vector<8x512xf32> -> vector<8x512xf32>
    %30 = vector.extract_strided_slice %3 {offsets = [2, 0], sizes = [1, 512], strides = [1, 1]} : vector<5x512xf32> to vector<1x512xf32>
    %31 = vector.shape_cast %30 : vector<1x512xf32> to vector<512xf32>
    %32 = vector.shape_cast %31 : vector<512xf32> to vector<1x512xf32>
    %33 = vector.broadcast %32 : vector<1x512xf32> to vector<8x512xf32>
    %34 = arith.addf %29, %33 : vector<8x512xf32>
    %35 = arith.truncf %34 : vector<8x512xf32> to vector<8x512xbf16>
    %c0_19 = arith.constant 0 : index
    %c3 = arith.constant 3 : index
    %c0_20 = arith.constant 0 : index
    %c0_21 = arith.constant 0 : index
    %36 = vector.load %arg3[%c0_19, %c3, %c0_20, %c0_21] : memref<1x5x512x512xbf16, #tpu.memory_space<vmem>>, vector<1x1x512x512xbf16>
    %37 = vector.shape_cast %36 : vector<1x1x512x512xbf16> to vector<512x512xbf16>
    %cst_22 = arith.constant dense<0.000000e+00> : vector<8x512xf32>
    %38 = tpu.matmul %35, %37, %cst_22 {dimension_numbers = #tpu.dot_dimension_numbers<[1], [0], [0], [1], [0, 0, 1, 1], [], []>} : vector<8x512xbf16>, vector<512x512xbf16>, vector<8x512xf32> -> vector<8x512xf32>
    %39 = vector.extract_strided_slice %3 {offsets = [3, 0], sizes = [1, 512], strides = [1, 1]} : vector<5x512xf32> to vector<1x512xf32>
    %40 = vector.shape_cast %39 : vector<1x512xf32> to vector<512xf32>
    %41 = vector.shape_cast %40 : vector<512xf32> to vector<1x512xf32>
    %42 = vector.broadcast %41 : vector<1x512xf32> to vector<8x512xf32>
    %43 = arith.addf %38, %42 : vector<8x512xf32>
    %cst_23 = arith.constant 0.000000e+00 : f32
    %44 = vector.broadcast %cst_23 : f32 to vector<8x512xf32>
    %45 = arith.maximumf %43, %44 : vector<8x512xf32>
    %46 = arith.truncf %45 : vector<8x512xf32> to vector<8x512xbf16>
    %c0_24 = arith.constant 0 : index
    %c4 = arith.constant 4 : index
    %c0_25 = arith.constant 0 : index
    %c0_26 = arith.constant 0 : index
    %47 = vector.load %arg3[%c0_24, %c4, %c0_25, %c0_26] : memref<1x5x512x512xbf16, #tpu.memory_space<vmem>>, vector<1x1x512x512xbf16>
    %48 = vector.shape_cast %47 : vector<1x1x512x512xbf16> to vector<512x512xbf16>
    %cst_27 = arith.constant dense<0.000000e+00> : vector<8x512xf32>
    %49 = tpu.matmul %46, %48, %cst_27 {dimension_numbers = #tpu.dot_dimension_numbers<[1], [0], [0], [1], [0, 0, 1, 1], [], []>} : vector<8x512xbf16>, vector<512x512xbf16>, vector<8x512xf32> -> vector<8x512xf32>
    %50 = vector.extract_strided_slice %3 {offsets = [4, 0], sizes = [1, 512], strides = [1, 1]} : vector<5x512xf32> to vector<1x512xf32>
    %51 = vector.shape_cast %50 : vector<1x512xf32> to vector<512xf32>
    %52 = vector.shape_cast %51 : vector<512xf32> to vector<1x512xf32>
    %53 = vector.broadcast %52 : vector<1x512xf32> to vector<8x512xf32>
    %54 = arith.addf %49, %53 : vector<8x512xf32>
    %c1_i32 = arith.constant 1 : i32
    %55 = arith.cmpi eq, %arg0, %c1_i32 : i32
    %56 = arith.extui %55 : i1 to i32
    %57 = arith.sitofp %56 : i32 to f32
    %cst_28 = arith.constant 0.000000e+00 : f32
    %58 = arith.addf %cst_28, %57 : f32
    %59 = vector.broadcast %58 : f32 to vector<8x512xf32>
    %60 = arith.mulf %59, %1 : vector<8x512xf32>
    %61 = arith.addf %54, %60 : vector<8x512xf32>
    %c0_29 = arith.constant 0 : index
    %c0_30 = arith.constant 0 : index
    %c0_31 = arith.constant 0 : index
    %62 = vector.load %arg5[%c0_29, %c0_30, %c0_31] : memref<1x8x512xf32, #tpu.memory_space<vmem>>, vector<1x8x512xf32>
    %63 = vector.shape_cast %62 : vector<1x8x512xf32> to vector<8x512xf32>
    %64 = vector.shape_cast %61 : vector<8x512xf32> to vector<1x8x512xf32>
    tpu.vector_store %arg5[%c0_29, %c0_30, %c0_31], %64 {strides = array<i32>} : memref<1x8x512xf32, #tpu.memory_space<vmem>>, vector<1x8x512xf32>,
    return
  }
  func.func @transform_0(%arg0: i32, %arg1: i32) -> (i32, i32, i32) {
    %c0_i32 = arith.constant 0 : i32
    %c0_i32_0 = arith.constant 0 : i32
    return %arg0, %arg1, %c0_i32 : i32, i32, i32
  }
  func.func @transform_1(%arg0: i32, %arg1: i32) -> (i32, i32, i32, i32) {
    %c0_i32 = arith.constant 0 : i32
    %c0_i32_0 = arith.constant 0 : i32
    %c0_i32_1 = arith.constant 0 : i32
    %c0_i32_2 = arith.constant 0 : i32
    return %arg0, %c0_i32, %c0_i32_0, %c0_i32_1 : i32, i32, i32, i32
  }
  func.func @transform_2(%arg0: i32, %arg1: i32) -> (i32, i32, i32) {
    %c0_i32 = arith.constant 0 : i32
    %c0_i32_0 = arith.constant 0 : i32
    %c0_i32_1 = arith.constant 0 : i32
    return %arg0, %c0_i32, %c0_i32_0 : i32, i32, i32
  }
  func.func @transform_3(%arg0: i32, %arg1: i32) -> (i32, i32, i32) {
    %c0_i32 = arith.constant 0 : i32
    %c0_i32_0 = arith.constant 0 : i32
    return %arg0, %arg1, %c0_i32 : i32, i32, i32
  }
}

</mosaic_0001>

<bundles_post_ra>
// kernel: asym_prob_adaptor_forward.1
= control target key start
LH: loop header
LB: loop body
LE: loop exit
PB: predicated region body
PF: predicated region fallthrough
CT: control target
= control target key end

     0   :  { %8 = vsyncpa [#allocation3], 0  ;;  %s8416_s0 = inlined_call_operand.vmem [shape: f32[2,8,512], index: 0, kind: input, shape index: {}]   ;;  %s8417_s1 = inlined_call_operand.hbm [shape: bf16[2,5,512,512], index: 1, kind: input, shape index: {}]   ;;  %s8418_s2 = inlined_call_operand.vmem [shape: f32[2,5,512], index: 2, kind: input, shape index: {}]   ;;  %s8419_s3 = inlined_call_operand.vmem [shape: f32[2,8,512], index: 3, kind: output, shape index: {}]  }
   0x1   :  { %10 = vsyncpa [#allocation3 + $0x1], 0  ;;  %s7546_s12 = smov 0   ;;  %s7548_s13 = smov 0  }
   0x2   :  { %s7550_s14 = smov 0   ;;  %s7552_s15 = smov 0  }
   0x3   :  { %s7554_s16 = smov 0   ;;  %s7556_s17 = smov 0  }
   0x4 LB: > { %s5196_s18 = sadd.s32 4294967295, %s7521_s17   ;;  %s28_s19 = sadd.s32 1, %s7517_s16  ;;  %s7521_s17 = sphi %s7556_s17, %s16_s17   ;;  %s7517_s16 = sphi %s7554_s16, %s8426_s16   ;;  %s7513_s15 = sphi %s7552_s15, %s8425_s15   ;;  %s7509_s14 = sphi %s7550_s14, %s8424_s14   ;;  %s7505_s13 = sphi %s7548_s13, %s8423_s13   ;;  %s7501_s12 = sphi %s7546_s12, %s8422_s12  }
   0x5   : > { %p30_p0 = scmp.ge.s32.totalorder %s28_s19, 2  ;;  %s63_s20 = sadd.s32 1, %s7509_s14 }
   0x6   : > { %p70_p1 = scmp.ne.s32.totalorder %s7509_s14, %s7505_s13  ;;  %p71_p2 = scmp.eq.s32.totalorder %s7521_s17, 0 }
   0x7   : > { %s8428_s19 = smov (%p30_p0, %s28_s19), 0  ;;  %p76_p4 = scmp.ne.s32.totalorder %s7505_s13, %s7501_s12 }
   0x8   : > { %p72_p3 = por %p71_p2, %p70_p1  ;;  %s60_s21 = ssub.s32 %s7517_s16, %s8428_s19 }
   0x9   : > { %p77_p5 = scmp.eq.s32.totalorder %s5196_s18, 0  ;;  %p61_p6 = scmp.eq.s32.totalorder %s60_s21, 0 }
   0xa   : > { %p6422_p8 = scmp.lt.s32.totalorder %s7521_s17, 2  ;;  %s166_s24 = sand.u32 1, %s7509_s14  }
   0xb   : > { %p7585_p7 = por %p77_p5, %p76_p4  ;;  %s6414_s25 = smul.u32 81920, %s7517_s16 }
   0xc   : > { %s7591_s23 = scalar_select %p61_p6, %s7509_s14, %s63_s20  }
   0xd   : > { %s6413_s26 = smul.u32 5120, %s166_s24  ;;  %s7598_s29 = scalar_lea.hbm %s8417_s1, %s6414_s25 }
   0xe   : > { %p7600_p9 = pnand %p6422_p8, %p72_p3  ;;  %s7606_s6 = scalar_lea.sflag [#allocation3], %s166_s24 }
   0xf   : > { %s170_s4 = scalar_lea.vmem [#allocation2], %s6413_s26  ;;  %s7441_s7 = scalar_lea.hbm %s7598_s29, 81920 }
  0x10   : > { %s177_s5 = sshll.u32 %s170_s4, 4  ;;  %p7442_p10 = scmp.ne.s32.totalorder %s7598_s29, %s7441_s7  ;;  %s7604_s5 = int_to_ptr.vmem [resolvable:$true] %s177_s5 }
  0x11   : > { %p7443_p11 = pneg %p7600_p9  ;;  %s7446_s10 = scalar_lea.hbm %s8417_s1, 163840 }
  0x12   : > { %p7447_p0 = scmp.lt.u32.totalorder %s7598_s29, %s8417_s1  ;;  %p7448_p1 = scmp.lt.u32.totalorder %s7446_s10, %s7441_s7 }
  0x13   : > { %p7444_p12 = pnand %p7443_p11, %p7442_p10  ;;  %p7450_p3 = scmp.lt.u32.totalorder %s7441_s7, %s7598_s29 }
  0x14   : > { %p7449_p2 = por %p7448_p1, %p7447_p0 }
  0x15   : > { %p7445_p13 = pneg %p7444_p12 }
  0x16   : > { %p7451_p4 = por %p7450_p3, %p7449_p2 }
  0x18   : > { %p7452_p5 = pnand %p7451_p4, %p7445_p13 }
  0x1a   : > { %7455 = shalt.err (!%p7452_p5)
}
  0x1b   : > { %s7456_s18 = scalar_lea.vmem %s7604_s5, 81920  ;;  %s7523_s20 = smov [#allocation2]  }
  0x1c   : > { %p7457_p6 = scmp.ne.s32.totalorder %s7604_s5, %s7456_s18  ;;  %s7461_s21 = sshll.u32 %s7523_s20, 4  ;;  %s7462_s21 = int_to_ptr.vmem [resolvable:$false] %s7461_s21 }
  0x1d   : > { %s7463_s24 = scalar_lea.vmem %s7462_s21, 163840  ;;  %p7464_p12 = scmp.lt.s32.totalorder %s7604_s5, %s7462_s21 }
  0x1e   : > { %p7459_p8 = pnand %p7457_p6, %p7443_p11  ;;  %p7465_p0 = scmp.lt.s32.totalorder %s7463_s24, %s7456_s18 }
  0x20   : > { %p7460_p10 = pneg %p7459_p8  ;;  %p7466_p1 = por %p7465_p0, %p7464_p12 }
  0x22   : > { %p7467_p2 = pnand %p7466_p1, %p7460_p10 }
  0x24   : > { %7470 = shalt.err (!%p7467_p2)
}
  0x25   : > { %s7524_s25 = smov 256   ;;  %s7525_s26 = smov 16  }
  0x26   : > { %6421 = dma.hbm_to_vmem [thread:$0]  (!%p7600_p9), %s7598_s29, 81920, %s7604_s5, %s7606_s6, %s7524_s25, %s7524_s25, %s7525_s26  }
  0x27   : > { %p5201_p11 = scmp.ge.s32.totalorder %s7521_s17, 1  ;;  %p193_p13 = scmp.lt.s32.totalorder %s7521_s17, 3 }
  0x29   : > { %p194_p3 = pnand %p5201_p11, %p193_p13 }
  0x2a   : > { %s199_s27 = sand.u32 (!%p194_p3), 1, %s7505_s13  }
  0x2b   : > { %197 = sbr.rel (%p194_p3) target bundleno = 1534 (0x5fe), region = 32  ;;  %s200_s4 = scalar_lea.sflag (!%p194_p3), [#allocation3], %s199_s27 }
  0x2c   : > { %s6415_s28 = smul.u32 (!%p194_p3), 5120, %s199_s27 }
  0x2e   : > { %s7637_s7 = scalar_lea.vmem (!%p194_p3), [#allocation2], %s6415_s28 }
  0x32   : > { %7496 = dma.done.wait (%p7585_p7), %s200_s4, 81920  }
  0x33   : > { %7498 = vsyncadd (%p7585_p7), %s200_s4, 4294885376  ;;  %v6473_v0 = vld [vmem:[%s7637_s7 + $0x4] ss:$16 sps:$4 sm:$0xff]   ;;  %v6475_v1 = vld [vmem:[%s7637_s7 + $0xc] ss:$16 sps:$4 sm:$0xff]   ;;  %p244_p7 = scmp.lt.s32.totalorder %s7513_s15, 1 }
  0x34   : > { %1063 = vmatprep.subr.bf16.mxu0 %v6473_v0  ;;  %v6477_v2 = vld [vmem:[%s7637_s7] ss:$16 sps:$4 sm:$0xff]   ;;  %v6478_v3 = vld [vmem:[%s7637_s7 + $0x8] ss:$16 sps:$4 sm:$0xff]   ;;  %1145 = vmatprep.subr.bf16.mxu1 %v6475_v1  ;;  %v6479_v4 = vld [vmem:[%s7637_s7 + $0x24] ss:$16 sps:$4 sm:$0xff]  }
  0x35   : > { %1064 = vmatpush1.bf16.msra.mxu0 %v6477_v2  ;;  %1146 = vmatpush1.bf16.msra.mxu1 %v6478_v3  ;;  %v6481_v5 = vld [vmem:[%s7637_s7 + $0x2c] ss:$16 sps:$4 sm:$0xff]   ;;  %v6483_v6 = vld [vmem:[%s7637_s7 + $0x20] ss:$16 sps:$4 sm:$0xff]   ;;  %v6484_v7 = vld [vmem:[%s7637_s7 + $0x28] ss:$16 sps:$4 sm:$0xff]  }
  0x36   : > { %1065 = vmatprep.subr.bf16.mxu0 %v6479_v4  ;;  %1147 = vmatprep.subr.bf16.mxu1 %v6481_v5  ;;  %v6485_v8 = vld [vmem:[%s7637_s7 + $0x44] ss:$16 sps:$4 sm:$0xff]   ;;  %v6487_v9 = vld [vmem:[%s7637_s7 + $0x4c] ss:$16 sps:$4 sm:$0xff]   ;;  %v6489_v10 = vld [vmem:[%s7637_s7 + $0x40] ss:$16 sps:$4 sm:$0xff]  }
  0x37   : > { %v6490_v11 = vld [vmem:[%s7637_s7 + $0x48] ss:$16 sps:$4 sm:$0xff]   ;;  %v6491_v12 = vld [vmem:[%s7637_s7 + $0x64] ss:$16 sps:$4 sm:$0xff]   ;;  %v6493_v13 = vld [vmem:[%s7637_s7 + $0x6c] ss:$16 sps:$4 sm:$0xff]  }
  0x38   : > { %v6495_v14 = vld [vmem:[%s7637_s7 + $0x60] ss:$16 sps:$4 sm:$0xff]   ;;  %v6496_v15 = vld [vmem:[%s7637_s7 + $0x68] ss:$16 sps:$4 sm:$0xff]   ;;  %v6497_v16 = vld [vmem:[%s7637_s7 + $0x84] ss:$16 sps:$4 sm:$0xff]  }
  0x39   : > { %1066 = vmatpush1.bf16.msra.mxu0 %v6483_v6  ;;  %1148 = vmatpush1.bf16.msra.mxu1 %v6484_v7  ;;  %v6499_v17 = vld [vmem:[%s7637_s7 + $0x8c] ss:$16 sps:$4 sm:$0xff]   ;;  %v6501_v18 = vld [vmem:[%s7637_s7 + $0x80] ss:$16 sps:$4 sm:$0xff]   ;;  %v6502_v19 = vld [vmem:[%s7637_s7 + $0x88] ss:$16 sps:$4 sm:$0xff]  }
  0x3a   : > { %1067 = vmatprep.subr.bf16.mxu0 %v6485_v8  ;;  %1149 = vmatprep.subr.bf16.mxu1 %v6487_v9  ;;  %v6503_v20 = vld [vmem:[%s7637_s7 + $0xa4] ss:$16 sps:$4 sm:$0xff]   ;;  %v6505_v21 = vld [vmem:[%s7637_s7 + $0xac] ss:$16 sps:$4 sm:$0xff]   ;;  %v6507_v22 = vld [vmem:[%s7637_s7 + $0xa0] ss:$16 sps:$4 sm:$0xff]  }
  0x3b   : > { %v6508_v23 = vld [vmem:[%s7637_s7 + $0xa8] ss:$16 sps:$4 sm:$0xff]   ;;  %v6509_v24 = vld [vmem:[%s7637_s7 + $0xc4] ss:$16 sps:$4 sm:$0xff]   ;;  %v6511_v25 = vld [vmem:[%s7637_s7 + $0xcc] ss:$16 sps:$4 sm:$0xff]  }
  0x3c   : > { %v6513_v26 = vld [vmem:[%s7637_s7 + $0xc0] ss:$16 sps:$4 sm:$0xff]   ;;  %v6514_v27 = vld [vmem:[%s7637_s7 + $0xc8] ss:$16 sps:$4 sm:$0xff]   ;;  %v6515_v28 = vld [vmem:[%s7637_s7 + $0xe4] ss:$16 sps:$4 sm:$0xff]  }
  0x3d   : > { %1068 = vmatpush1.bf16.msra.mxu0 %v6489_v10  ;;  %1150 = vmatpush1.bf16.msra.mxu1 %v6490_v11  ;;  %v6517_v29 = vld [vmem:[%s7637_s7 + $0xec] ss:$16 sps:$4 sm:$0xff]   ;;  %v6519_v30 = vld [vmem:[%s7637_s7 + $0xe0] ss:$16 sps:$4 sm:$0xff]   ;;  %v6520_v31 = vld [vmem:[%s7637_s7 + $0xe8] ss:$16 sps:$4 sm:$0xff]  }
  0x3e   : > { %1069 = vmatprep.subr.bf16.mxu0 %v6491_v12  ;;  %1151 = vmatprep.subr.bf16.mxu1 %v6493_v13  ;;  %v6521_v32 = vld [vmem:[%s7637_s7 + $0x104] ss:$16 sps:$4 sm:$0xff]   ;;  %v6523_v33 = vld [vmem:[%s7637_s7 + $0x10c] ss:$16 sps:$4 sm:$0xff]   ;;  %v6525_v34 = vld [vmem:[%s7637_s7 + $0x100] ss:$16 sps:$4 sm:$0xff]  }
  0x3f   : > { %v6526_v35 = vld [vmem:[%s7637_s7 + $0x108] ss:$16 sps:$4 sm:$0xff]   ;;  %v6527_v36 = vld [vmem:[%s7637_s7 + $0x124] ss:$16 sps:$4 sm:$0xff]   ;;  %s245_s22 = scalar_select %p244_p7, %s7513_s15, 1 }
  0x40   : > { %v6529_v37 = vld [vmem:[%s7637_s7 + $0x12c] ss:$16 sps:$4 sm:$0xff]   ;;  %v6531_v38 = vld [vmem:[%s7637_s7 + $0x120] ss:$16 sps:$4 sm:$0xff]   ;;  %v6532_v39 = vld [vmem:[%s7637_s7 + $0x128] ss:$16 sps:$4 sm:$0xff]  }
  0x41   : > { %1070 = vmatpush1.bf16.msra.mxu0 %v6495_v14  ;;  %1152 = vmatpush1.bf16.msra.mxu1 %v6496_v15  ;;  %v6533_v40 = vld [vmem:[%s7637_s7 + $0x144] ss:$16 sps:$4 sm:$0xff]   ;;  %s7686_s29 = sshll.u32 %s245_s22, 5  ;;  %v6535_v41 = vld [vmem:[%s7637_s7 + $0x14c] ss:$16 sps:$4 sm:$0xff]   ;;  %p5051_p9 = scmp.eq.s32.totalorder %s7513_s15, 1 }
  0x42   : > { %1071 = vmatprep.subr.bf16.mxu0 %v6497_v16  ;;  %1153 = vmatprep.subr.bf16.mxu1 %v6499_v17  ;;  %v6537_v42 = vld [vmem:[%s7637_s7 + $0x140] ss:$16 sps:$4 sm:$0xff]   ;;  %v6538_v43 = vld [vmem:[%s7637_s7 + $0x148] ss:$16 sps:$4 sm:$0xff]   ;;  %s7695_s6 = scalar_lea.vmem %s8416_s0, %s7686_s29  ;;  %v6539_v44 = vld [vmem:[%s7637_s7 + $0x164] ss:$16 sps:$4 sm:$0xff]   ;;  %s7857_s10 = scalar_lea.vmem %s8418_s2, %s7686_s29 }
  0x43   : > { %v6541_v45 = vld [vmem:[%s7637_s7 + $0x16c] ss:$16 sps:$4 sm:$0xff]   ;;  %v6543_v47 = vld [vmem:[%s7637_s7 + $0x160] ss:$16 sps:$4 sm:$0xff]   ;;  %v6544_v49 = vld [vmem:[%s7637_s7 + $0x168] ss:$16 sps:$4 sm:$0xff]   ;;  %s266_s20 = scalar_lea.vmem %s8419_s3, %s7686_s29 }
  0x44   : > { %v268_v46 = vld [vmem:[%s7695_s6 + $0x8] sm:$0xff]  ;;  %v6545_v50 = vld [vmem:[%s7637_s7 + $0x184] ss:$16 sps:$4 sm:$0xff]   ;;  %v6549_v52 = vld [vmem:[%s7637_s7 + $0x180] ss:$16 sps:$4 sm:$0xff]  }
  0x45   : > { %1072 = vmatpush1.bf16.msra.mxu0 %v6501_v18  ;;  %1154 = vmatpush1.bf16.msra.mxu1 %v6502_v19  ;;  %v276_v48 = vpack.c.bf16 %v268_v46, %v268_v46  ;;  %v6547_v51 = vld [vmem:[%s7637_s7 + $0x18c] ss:$16 sps:$4 sm:$0xff]   ;;  %v6550_v53 = vld [vmem:[%s7637_s7 + $0x188] ss:$16 sps:$4 sm:$0xff]   ;;  %v6551_v54 = vld [vmem:[%s7637_s7 + $0x1a4] ss:$16 sps:$4 sm:$0xff]  }
  0x46   : > { %1073 = vmatprep.subr.bf16.mxu0 %v6503_v20  ;;  %1155 = vmatprep.subr.bf16.mxu1 %v6505_v21  ;;  %v6553_v55 = vld [vmem:[%s7637_s7 + $0x1ac] ss:$16 sps:$4 sm:$0xff]   ;;  %v6555_v56 = vld [vmem:[%s7637_s7 + $0x1a0] ss:$16 sps:$4 sm:$0xff]   ;;  %v6556_v57 = vld [vmem:[%s7637_s7 + $0x1a8] ss:$16 sps:$4 sm:$0xff]  }
  0x47   : > { %1095 = vmatprep.mubr.bf16.mxu0 %v276_v48  ;;  %1177 = vmatprep.mubr.bf16.mxu1 %v276_v48  ;;  %v6557_v58 = vld [vmem:[%s7637_s7 + $0x1c4] ss:$16 sps:$4 sm:$0xff]   ;;  %v6559_v59 = vld [vmem:[%s7637_s7 + $0x1cc] ss:$16 sps:$4 sm:$0xff]   ;;  %v6561_v60 = vld [vmem:[%s7637_s7 + $0x1c0] ss:$16 sps:$4 sm:$0xff]  }
  0x48   : > { %v6562_v61 = vld [vmem:[%s7637_s7 + $0x1c8] ss:$16 sps:$4 sm:$0xff]   ;;  %v6563_v62 = vld [vmem:[%s7637_s7 + $0x1e4] ss:$16 sps:$4 sm:$0xff]   ;;  %v6565_v63 = vld [vmem:[%s7637_s7 + $0x1ec] ss:$16 sps:$4 sm:$0xff]  }
  0x49   : > { %1074 = vmatpush1.bf16.msra.mxu0 %v6507_v22  ;;  %1156 = vmatpush1.bf16.msra.mxu1 %v6508_v23  ;;  %v6567_v0 = vld [vmem:[%s7637_s7 + $0x1e0] ss:$16 sps:$4 sm:$0xff]   ;;  %v6568_v1 = vld [vmem:[%s7637_s7 + $0x1e8] ss:$16 sps:$4 sm:$0xff]   ;;  %v6571_v3 = vld [vmem:[%s7637_s7 + $0x204] ss:$16 sps:$4 sm:$0xff]  }
  0x4a   : > { %1075 = vmatprep.subr.bf16.mxu0 %v6509_v24  ;;  %1157 = vmatprep.subr.bf16.mxu1 %v6511_v25  ;;  %v267_v2 = vld [vmem:[%s7695_s6] sm:$0xff]  ;;  %v6574_v4 = vld [vmem:[%s7637_s7 + $0x20c] ss:$16 sps:$4 sm:$0xff]   ;;  %v6572_v7 = vld [vmem:[%s7637_s7 + $0x208] ss:$16 sps:$4 sm:$0xff]  }
  0x4b   : > { %v275_v5 = vpack.c.bf16 %v267_v2, %v267_v2  ;;  %v6569_v6 = vld [vmem:[%s7637_s7 + $0x200] ss:$16 sps:$4 sm:$0xff]   ;;  %v6577_v8 = vld [vmem:[%s7637_s7 + $0x224] ss:$16 sps:$4 sm:$0xff]   ;;  %v6580_v9 = vld [vmem:[%s7637_s7 + $0x22c] ss:$16 sps:$4 sm:$0xff]  }
  0x4c   : > { %v6575_v10 = vld [vmem:[%s7637_s7 + $0x220] ss:$16 sps:$4 sm:$0xff]   ;;  %v6578_v11 = vld [vmem:[%s7637_s7 + $0x228] ss:$16 sps:$4 sm:$0xff]   ;;  %v6583_v12 = vld [vmem:[%s7637_s7 + $0x244] ss:$16 sps:$4 sm:$0xff]  }
  0x4d   : > { %1076 = vmatpush1.bf16.msra.mxu0 %v6513_v26  ;;  %1158 = vmatpush1.bf16.msra.mxu1 %v6514_v27  ;;  %v6586_v13 = vld [vmem:[%s7637_s7 + $0x24c] ss:$16 sps:$4 sm:$0xff]   ;;  %v6581_v14 = vld [vmem:[%s7637_s7 + $0x240] ss:$16 sps:$4 sm:$0xff]   ;;  %v6584_v15 = vld [vmem:[%s7637_s7 + $0x248] ss:$16 sps:$4 sm:$0xff]  }
  0x4e   : > { %1077 = vmatprep.subr.bf16.mxu0 %v6515_v28  ;;  %1159 = vmatprep.subr.bf16.mxu1 %v6517_v29  ;;  %v6589_v16 = vld [vmem:[%s7637_s7 + $0x264] ss:$16 sps:$4 sm:$0xff]   ;;  %v6592_v17 = vld [vmem:[%s7637_s7 + $0x26c] ss:$16 sps:$4 sm:$0xff]   ;;  %v6587_v18 = vld [vmem:[%s7637_s7 + $0x260] ss:$16 sps:$4 sm:$0xff]  }
  0x4f   : > { %v6590_v19 = vld [vmem:[%s7637_s7 + $0x268] ss:$16 sps:$4 sm:$0xff]   ;;  %v6595_v20 = vld [vmem:[%s7637_s7 + $0x284] ss:$16 sps:$4 sm:$0xff]   ;;  %v6598_v21 = vld [vmem:[%s7637_s7 + $0x28c] ss:$16 sps:$4 sm:$0xff]  }
  0x50   : > { %v6593_v22 = vld [vmem:[%s7637_s7 + $0x280] ss:$16 sps:$4 sm:$0xff]   ;;  %v6596_v23 = vld [vmem:[%s7637_s7 + $0x288] ss:$16 sps:$4 sm:$0xff]   ;;  %v6601_v24 = vld [vmem:[%s7637_s7 + $0x2a4] ss:$16 sps:$4 sm:$0xff]  }
  0x51   : > { %1078 = vmatpush1.bf16.msra.mxu0 %v6519_v30  ;;  %1160 = vmatpush1.bf16.msra.mxu1 %v6520_v31  ;;  %v6604_v25 = vld [vmem:[%s7637_s7 + $0x2ac] ss:$16 sps:$4 sm:$0xff]   ;;  %v6599_v26 = vld [vmem:[%s7637_s7 + $0x2a0] ss:$16 sps:$4 sm:$0xff]   ;;  %v6602_v27 = vld [vmem:[%s7637_s7 + $0x2a8] ss:$16 sps:$4 sm:$0xff]  }
  0x52   : > { %1079 = vmatprep.subr.bf16.mxu0 %v6521_v32  ;;  %1161 = vmatprep.subr.bf16.mxu1 %v6523_v33  ;;  %v6607_v28 = vld [vmem:[%s7637_s7 + $0x2c4] ss:$16 sps:$4 sm:$0xff]   ;;  %v6610_v29 = vld [vmem:[%s7637_s7 + $0x2cc] ss:$16 sps:$4 sm:$0xff]   ;;  %v6605_v31 = vld [vmem:[%s7637_s7 + $0x2c0] ss:$16 sps:$4 sm:$0xff]  }
  0x53   : > { %v270_v30 = vld [vmem:[%s7695_s6 + $0x18] sm:$0xff]  ;;  %v6631_v46 = vld [vmem:[%s7637_s7 + $0x344] ss:$16 sps:$4 sm:$0xff]   ;;  %v6629_v48 = vld [vmem:[%s7637_s7 + $0x340] ss:$16 sps:$4 sm:$0xff]  }
  0x54   : > { %v6608_v32 = vld [vmem:[%s7637_s7 + $0x2c8] ss:$16 sps:$4 sm:$0xff]   ;;  %v278_v33 = vpack.c.bf16 %v270_v30, %v270_v30  ;;  %v6661_v2 = vld [vmem:[%s7637_s7 + $0x3e4] ss:$16 sps:$4 sm:$0xff]   ;;  %v6695_v30 = vld [vmem:[%s7637_s7 + $0x4a0] ss:$16 sps:$4 sm:$0xff]  }
  0x55   : > { %1080 = vmatpush1.bf16.msra.mxu0 %v6525_v34  ;;  %1162 = vmatpush1.bf16.msra.mxu1 %v6526_v35  ;;  %v6613_v34 = vld [vmem:[%s7637_s7 + $0x2e4] ss:$16 sps:$4 sm:$0xff]   ;;  %v6616_v35 = vld [vmem:[%s7637_s7 + $0x2ec] ss:$16 sps:$4 sm:$0xff]   ;;  %s5052_s11 = scalar_select %p5051_p9, 1, 0 }
  0x56   : > { %1081 = vmatprep.subr.bf16.mxu0 %v6527_v36  ;;  %1163 = vmatprep.subr.bf16.mxu1 %v6529_v37  ;;  %v6611_v36 = vld [vmem:[%s7637_s7 + $0x2e0] ss:$16 sps:$4 sm:$0xff]   ;;  %v6614_v37 = vld [vmem:[%s7637_s7 + $0x2e8] ss:$16 sps:$4 sm:$0xff]  }
  0x57   : > { %s5053_s12 = scvt.s32.f32 %s5052_s11 }
  0x59   : > { %1082 = vmatpush1.bf16.msra.mxu0 %v6531_v38  ;;  %1164 = vmatpush1.bf16.msra.mxu1 %v6532_v39  ;;  %v6619_v38 = vld [vmem:[%s7637_s7 + $0x304] ss:$16 sps:$4 sm:$0xff]   ;;  %v6622_v39 = vld [vmem:[%s7637_s7 + $0x30c] ss:$16 sps:$4 sm:$0xff]  }
  0x5a   : > { %1083 = vmatprep.subr.bf16.mxu0 %v6533_v40  ;;  %1165 = vmatprep.subr.bf16.mxu1 %v6535_v41  ;;  %v6617_v40 = vld [vmem:[%s7637_s7 + $0x300] ss:$16 sps:$4 sm:$0xff]   ;;  %v6620_v41 = vld [vmem:[%s7637_s7 + $0x308] ss:$16 sps:$4 sm:$0xff]  }
  0x5d   : > { %1084 = vmatpush1.bf16.msra.mxu0 %v6537_v42  ;;  %1166 = vmatpush1.bf16.msra.mxu1 %v6538_v43  ;;  %v6625_v42 = vld [vmem:[%s7637_s7 + $0x324] ss:$16 sps:$4 sm:$0xff]   ;;  %v6628_v43 = vld [vmem:[%s7637_s7 + $0x32c] ss:$16 sps:$4 sm:$0xff]  }
  0x5e   : > { %1085 = vmatprep.subr.bf16.mxu0 %v6539_v44  ;;  %1167 = vmatprep.subr.bf16.mxu1 %v6541_v45  ;;  %v6623_v44 = vld [vmem:[%s7637_s7 + $0x320] ss:$16 sps:$4 sm:$0xff]   ;;  %v6626_v45 = vld [vmem:[%s7637_s7 + $0x328] ss:$16 sps:$4 sm:$0xff]  }
  0x61   : > { %1086 = vmatpush1.bf16.msra.mxu0 %v6543_v47  ;;  %1168 = vmatpush1.bf16.msra.mxu1 %v6544_v49  ;;  %v6634_v47 = vld [vmem:[%s7637_s7 + $0x34c] ss:$16 sps:$4 sm:$0xff]   ;;  %v6632_v49 = vld [vmem:[%s7637_s7 + $0x348] ss:$16 sps:$4 sm:$0xff]  }
  0x62   : > { %1087 = vmatprep.subr.bf16.mxu0 %v6545_v50  ;;  %1169 = vmatprep.subr.bf16.mxu1 %v6547_v51  ;;  %v6637_v50 = vld [vmem:[%s7637_s7 + $0x364] ss:$16 sps:$4 sm:$0xff]   ;;  %v6640_v51 = vld [vmem:[%s7637_s7 + $0x36c] ss:$16 sps:$4 sm:$0xff]  }
  0x65   : > { %1088 = vmatpush1.bf16.msra.mxu0 %v6549_v52  ;;  %1170 = vmatpush1.bf16.msra.mxu1 %v6550_v53  ;;  %v6635_v52 = vld [vmem:[%s7637_s7 + $0x360] ss:$16 sps:$4 sm:$0xff]   ;;  %v6638_v53 = vld [vmem:[%s7637_s7 + $0x368] ss:$16 sps:$4 sm:$0xff]  }
  0x66   : > { %1089 = vmatprep.subr.bf16.mxu0 %v6551_v54  ;;  %1171 = vmatprep.subr.bf16.mxu1 %v6553_v55  ;;  %v6643_v54 = vld [vmem:[%s7637_s7 + $0x384] ss:$16 sps:$4 sm:$0xff]   ;;  %v6646_v55 = vld [vmem:[%s7637_s7 + $0x38c] ss:$16 sps:$4 sm:$0xff]  }
  0x69   : > { %1090 = vmatpush1.bf16.msra.mxu0 %v6555_v56  ;;  %1172 = vmatpush1.bf16.msra.mxu1 %v6556_v57  ;;  %v6641_v56 = vld [vmem:[%s7637_s7 + $0x380] ss:$16 sps:$4 sm:$0xff]   ;;  %v6644_v57 = vld [vmem:[%s7637_s7 + $0x388] ss:$16 sps:$4 sm:$0xff]  }
  0x6a   : > { %1091 = vmatprep.subr.bf16.mxu0 %v6557_v58  ;;  %1173 = vmatprep.subr.bf16.mxu1 %v6559_v59  ;;  %v6649_v58 = vld [vmem:[%s7637_s7 + $0x3a4] ss:$16 sps:$4 sm:$0xff]   ;;  %v6652_v59 = vld [vmem:[%s7637_s7 + $0x3ac] ss:$16 sps:$4 sm:$0xff]  }
  0x6d   : > { %1092 = vmatpush1.bf16.msra.mxu0 %v6561_v60  ;;  %1174 = vmatpush1.bf16.msra.mxu1 %v6562_v61  ;;  %v6647_v60 = vld [vmem:[%s7637_s7 + $0x3a0] ss:$16 sps:$4 sm:$0xff]   ;;  %v6650_v61 = vld [vmem:[%s7637_s7 + $0x3a8] ss:$16 sps:$4 sm:$0xff]  }
  0x6e   : > { %1093 = vmatprep.subr.bf16.mxu0 %v6563_v62  ;;  %1175 = vmatprep.subr.bf16.mxu1 %v6565_v63  ;;  %v6655_v62 = vld [vmem:[%s7637_s7 + $0x3c4] ss:$16 sps:$4 sm:$0xff]   ;;  %v6658_v63 = vld [vmem:[%s7637_s7 + $0x3cc] ss:$16 sps:$4 sm:$0xff]  }
  0x71   : > { %1094 = vmatpush1.bf16.msra.mxu0 %v6567_v0  ;;  %1176 = vmatpush1.bf16.msra.mxu1 %v6568_v1  ;;  %v6653_v0 = vld [vmem:[%s7637_s7 + $0x3c0] ss:$16 sps:$4 sm:$0xff]   ;;  %v6656_v1 = vld [vmem:[%s7637_s7 + $0x3c8] ss:$16 sps:$4 sm:$0xff]  }
  0x72   : > { %1104 = vmatprep.subr.bf16.mxu0 %v6571_v3  ;;  %1186 = vmatprep.subr.bf16.mxu1 %v6574_v4  ;;  %v6664_v3 = vld [vmem:[%s7637_s7 + $0x3ec] ss:$16 sps:$4 sm:$0xff]   ;;  %v6659_v4 = vld [vmem:[%s7637_s7 + $0x3e0] ss:$16 sps:$4 sm:$0xff]  }
  0x74   : > { %1096 = vmatmul.mubr.bf16.vlgmr.msra.gmra.mrb[0].mxu0 %v275_v5  ;;  %1178 = vmatmul.mubr.bf16.vlgmr.msra.gmra.mrb[0].mxu1 %v275_v5  ;;  %v6662_v5 = vld [vmem:[%s7637_s7 + $0x3e8] ss:$16 sps:$4 sm:$0xff]  }
  0x75   : > { %1105 = vmatpush1.bf16.msra.mxu0 %v6569_v6  ;;  %1187 = vmatpush1.bf16.msra.mxu1 %v6572_v7  ;;  %v269_v6 = vld [vmem:[%s7695_s6 + $0x10] sm:$0xff] }
  0x76   : > { %1106 = vmatprep.subr.bf16.mxu0 %v6577_v8  ;;  %1188 = vmatprep.subr.bf16.mxu1 %v6580_v9  ;;  %v6667_v7 = vld [vmem:[%s7637_s7 + $0x404] ss:$16 sps:$4 sm:$0xff]   ;;  %v6670_v8 = vld [vmem:[%s7637_s7 + $0x40c] ss:$16 sps:$4 sm:$0xff]   ;;  %v6665_v9 = vld [vmem:[%s7637_s7 + $0x400] ss:$16 sps:$4 sm:$0xff]  }
  0x77   : > { %1136 = vmatprep.mubr.bf16.mxu0 %v278_v33  ;;  %1218 = vmatprep.mubr.bf16.mxu1 %v278_v33  ;;  %v6706_v33 = vld [vmem:[%s7637_s7 + $0x4cc] ss:$16 sps:$4 sm:$0xff]  }
  0x79   : > { %1107 = vmatpush1.bf16.msra.mxu0 %v6575_v10  ;;  %1189 = vmatpush1.bf16.msra.mxu1 %v6578_v11  ;;  %v6668_v10 = vld [vmem:[%s7637_s7 + $0x408] ss:$16 sps:$4 sm:$0xff]   ;;  %v277_v11 = vpack.c.bf16 %v269_v6, %v269_v6  ;;  %v6755_v6 = vld [vmem:[%s7637_s7 + $0x5e0] ss:$16 sps:$4 sm:$0xff]  }
  0x7a   : > { %1108 = vmatprep.subr.bf16.mxu0 %v6583_v12  ;;  %1190 = vmatprep.subr.bf16.mxu1 %v6586_v13  ;;  %v6673_v12 = vld [vmem:[%s7637_s7 + $0x424] ss:$16 sps:$4 sm:$0xff]   ;;  %v6676_v13 = vld [vmem:[%s7637_s7 + $0x42c] ss:$16 sps:$4 sm:$0xff]  }
  0x7d   : > { %1109 = vmatpush1.bf16.msra.mxu0 %v6581_v14  ;;  %1191 = vmatpush1.bf16.msra.mxu1 %v6584_v15  ;;  %v6671_v14 = vld [vmem:[%s7637_s7 + $0x420] ss:$16 sps:$4 sm:$0xff]   ;;  %v6674_v15 = vld [vmem:[%s7637_s7 + $0x428] ss:$16 sps:$4 sm:$0xff]  }
  0x7e   : > { %1110 = vmatprep.subr.bf16.mxu0 %v6589_v16  ;;  %1192 = vmatprep.subr.bf16.mxu1 %v6592_v17  ;;  %v6679_v16 = vld [vmem:[%s7637_s7 + $0x444] ss:$16 sps:$4 sm:$0xff]   ;;  %v6682_v17 = vld [vmem:[%s7637_s7 + $0x44c] ss:$16 sps:$4 sm:$0xff]  }
  0x81   : > { %1111 = vmatpush1.bf16.msra.mxu0 %v6587_v18  ;;  %1193 = vmatpush1.bf16.msra.mxu1 %v6590_v19  ;;  %v6677_v18 = vld [vmem:[%s7637_s7 + $0x440] ss:$16 sps:$4 sm:$0xff]   ;;  %v6680_v19 = vld [vmem:[%s7637_s7 + $0x448] ss:$16 sps:$4 sm:$0xff]  }
  0x82   : > { %1112 = vmatprep.subr.bf16.mxu0 %v6595_v20  ;;  %1194 = vmatprep.subr.bf16.mxu1 %v6598_v21  ;;  %v6685_v20 = vld [vmem:[%s7637_s7 + $0x464] ss:$16 sps:$4 sm:$0xff]   ;;  %v6688_v21 = vld [vmem:[%s7637_s7 + $0x46c] ss:$16 sps:$4 sm:$0xff]  }
  0x85   : > { %1113 = vmatpush1.bf16.msra.mxu0 %v6593_v22  ;;  %1195 = vmatpush1.bf16.msra.mxu1 %v6596_v23  ;;  %v6683_v22 = vld [vmem:[%s7637_s7 + $0x460] ss:$16 sps:$4 sm:$0xff]   ;;  %v6686_v23 = vld [vmem:[%s7637_s7 + $0x468] ss:$16 sps:$4 sm:$0xff]  }
  0x86   : > { %1114 = vmatprep.subr.bf16.mxu0 %v6601_v24  ;;  %1196 = vmatprep.subr.bf16.mxu1 %v6604_v25  ;;  %v6691_v24 = vld [vmem:[%s7637_s7 + $0x484] ss:$16 sps:$4 sm:$0xff]   ;;  %v6694_v25 = vld [vmem:[%s7637_s7 + $0x48c] ss:$16 sps:$4 sm:$0xff]  }
  0x89   : > { %1115 = vmatpush1.bf16.msra.mxu0 %v6599_v26  ;;  %1197 = vmatpush1.bf16.msra.mxu1 %v6602_v27  ;;  %v6689_v26 = vld [vmem:[%s7637_s7 + $0x480] ss:$16 sps:$4 sm:$0xff]   ;;  %v6692_v27 = vld [vmem:[%s7637_s7 + $0x488] ss:$16 sps:$4 sm:$0xff]  }
  0x8a   : > { %1116 = vmatprep.subr.bf16.mxu0 %v6607_v28  ;;  %1198 = vmatprep.subr.bf16.mxu1 %v6610_v29  ;;  %v6697_v28 = vld [vmem:[%s7637_s7 + $0x4a4] ss:$16 sps:$4 sm:$0xff]   ;;  %v6700_v29 = vld [vmem:[%s7637_s7 + $0x4ac] ss:$16 sps:$4 sm:$0xff]  }
  0x8d   : > { %1117 = vmatpush1.bf16.msra.mxu0 %v6605_v31  ;;  %1199 = vmatpush1.bf16.msra.mxu1 %v6608_v32  ;;  %v6698_v31 = vld [vmem:[%s7637_s7 + $0x4a8] ss:$16 sps:$4 sm:$0xff]   ;;  %v6703_v32 = vld [vmem:[%s7637_s7 + $0x4c4] ss:$16 sps:$4 sm:$0xff]  }
  0x8e   : > { %1118 = vmatprep.subr.bf16.mxu0 %v6613_v34  ;;  %1200 = vmatprep.subr.bf16.mxu1 %v6616_v35  ;;  %v6701_v34 = vld [vmem:[%s7637_s7 + $0x4c0] ss:$16 sps:$4 sm:$0xff]   ;;  %v6704_v35 = vld [vmem:[%s7637_s7 + $0x4c8] ss:$16 sps:$4 sm:$0xff]  }
  0x91   : > { %1119 = vmatpush1.bf16.msra.mxu0 %v6611_v36  ;;  %1201 = vmatpush1.bf16.msra.mxu1 %v6614_v37  ;;  %v6709_v36 = vld [vmem:[%s7637_s7 + $0x4e4] ss:$16 sps:$4 sm:$0xff]   ;;  %v6712_v37 = vld [vmem:[%s7637_s7 + $0x4ec] ss:$16 sps:$4 sm:$0xff]  }
  0x92   : > { %1120 = vmatprep.subr.bf16.mxu0 %v6619_v38  ;;  %1202 = vmatprep.subr.bf16.mxu1 %v6622_v39  ;;  %v6707_v38 = vld [vmem:[%s7637_s7 + $0x4e0] ss:$16 sps:$4 sm:$0xff]   ;;  %v6710_v39 = vld [vmem:[%s7637_s7 + $0x4e8] ss:$16 sps:$4 sm:$0xff]  }
  0x95   : > { %1121 = vmatpush1.bf16.msra.mxu0 %v6617_v40  ;;  %1203 = vmatpush1.bf16.msra.mxu1 %v6620_v41  ;;  %v6715_v40 = vld [vmem:[%s7637_s7 + $0x504] ss:$16 sps:$4 sm:$0xff]   ;;  %v6718_v41 = vld [vmem:[%s7637_s7 + $0x50c] ss:$16 sps:$4 sm:$0xff]  }
  0x96   : > { %1122 = vmatprep.subr.bf16.mxu0 %v6625_v42  ;;  %1204 = vmatprep.subr.bf16.mxu1 %v6628_v43  ;;  %v6713_v42 = vld [vmem:[%s7637_s7 + $0x500] ss:$16 sps:$4 sm:$0xff]   ;;  %v6716_v43 = vld [vmem:[%s7637_s7 + $0x508] ss:$16 sps:$4 sm:$0xff]  }
  0x99   : > { %1123 = vmatpush1.bf16.msra.mxu0 %v6623_v44  ;;  %1205 = vmatpush1.bf16.msra.mxu1 %v6626_v45  ;;  %v6721_v44 = vld [vmem:[%s7637_s7 + $0x524] ss:$16 sps:$4 sm:$0xff]   ;;  %v6724_v45 = vld [vmem:[%s7637_s7 + $0x52c] ss:$16 sps:$4 sm:$0xff]  }
  0x9a   : > { %1124 = vmatprep.subr.bf16.mxu0 %v6631_v46  ;;  %1206 = vmatprep.subr.bf16.mxu1 %v6634_v47  ;;  %v6719_v46 = vld [vmem:[%s7637_s7 + $0x520] ss:$16 sps:$4 sm:$0xff]   ;;  %v6722_v47 = vld [vmem:[%s7637_s7 + $0x528] ss:$16 sps:$4 sm:$0xff]  }
  0x9d   : > { %1125 = vmatpush1.bf16.msra.mxu0 %v6629_v48  ;;  %1207 = vmatpush1.bf16.msra.mxu1 %v6632_v49  ;;  %v6727_v48 = vld [vmem:[%s7637_s7 + $0x544] ss:$16 sps:$4 sm:$0xff]   ;;  %v6730_v49 = vld [vmem:[%s7637_s7 + $0x54c] ss:$16 sps:$4 sm:$0xff]  }
  0x9e   : > { %1126 = vmatprep.subr.bf16.mxu0 %v6637_v50  ;;  %1208 = vmatprep.subr.bf16.mxu1 %v6640_v51  ;;  %v6725_v50 = vld [vmem:[%s7637_s7 + $0x540] ss:$16 sps:$4 sm:$0xff]   ;;  %v6728_v51 = vld [vmem:[%s7637_s7 + $0x548] ss:$16 sps:$4 sm:$0xff]  }
  0xa1   : > { %1127 = vmatpush1.bf16.msra.mxu0 %v6635_v52  ;;  %1209 = vmatpush1.bf16.msra.mxu1 %v6638_v53  ;;  %v6733_v52 = vld [vmem:[%s7637_s7 + $0x564] ss:$16 sps:$4 sm:$0xff]   ;;  %v6736_v53 = vld [vmem:[%s7637_s7 + $0x56c] ss:$16 sps:$4 sm:$0xff]  }
  0xa2   : > { %1128 = vmatprep.subr.bf16.mxu0 %v6643_v54  ;;  %1210 = vmatprep.subr.bf16.mxu1 %v6646_v55  ;;  %v6731_v54 = vld [vmem:[%s7637_s7 + $0x560] ss:$16 sps:$4 sm:$0xff]   ;;  %v6734_v55 = vld [vmem:[%s7637_s7 + $0x568] ss:$16 sps:$4 sm:$0xff]  }
  0xa5   : > { %1129 = vmatpush1.bf16.msra.mxu0 %v6641_v56  ;;  %1211 = vmatpush1.bf16.msra.mxu1 %v6644_v57  ;;  %v6739_v56 = vld [vmem:[%s7637_s7 + $0x584] ss:$16 sps:$4 sm:$0xff]   ;;  %v6742_v57 = vld [vmem:[%s7637_s7 + $0x58c] ss:$16 sps:$4 sm:$0xff]  }
  0xa6   : > { %1130 = vmatprep.subr.bf16.mxu0 %v6649_v58  ;;  %1212 = vmatprep.subr.bf16.mxu1 %v6652_v59  ;;  %v6737_v58 = vld [vmem:[%s7637_s7 + $0x580] ss:$16 sps:$4 sm:$0xff]   ;;  %v6740_v59 = vld [vmem:[%s7637_s7 + $0x588] ss:$16 sps:$4 sm:$0xff]  }
  0xa9   : > { %1131 = vmatpush1.bf16.msra.mxu0 %v6647_v60  ;;  %1213 = vmatpush1.bf16.msra.mxu1 %v6650_v61  ;;  %v6745_v60 = vld [vmem:[%s7637_s7 + $0x5a4] ss:$16 sps:$4 sm:$0xff]   ;;  %v6748_v61 = vld [vmem:[%s7637_s7 + $0x5ac] ss:$16 sps:$4 sm:$0xff]  }
  0xaa   : > { %1132 = vmatprep.subr.bf16.mxu0 %v6655_v62  ;;  %1214 = vmatprep.subr.bf16.mxu1 %v6658_v63  ;;  %v6743_v62 = vld [vmem:[%s7637_s7 + $0x5a0] ss:$16 sps:$4 sm:$0xff]   ;;  %v6746_v63 = vld [vmem:[%s7637_s7 + $0x5a8] ss:$16 sps:$4 sm:$0xff]  }
  0xad   : > { %1133 = vmatpush1.bf16.msra.mxu0 %v6653_v0  ;;  %1215 = vmatpush1.bf16.msra.mxu1 %v6656_v1  ;;  %v6751_v0 = vld [vmem:[%s7637_s7 + $0x5c4] ss:$16 sps:$4 sm:$0xff]   ;;  %v6754_v1 = vld [vmem:[%s7637_s7 + $0x5cc] ss:$16 sps:$4 sm:$0xff]  }
  0xae   : > { %1134 = vmatprep.subr.bf16.mxu0 %v6661_v2  ;;  %1216 = vmatprep.subr.bf16.mxu1 %v6664_v3  ;;  %v6749_v2 = vld [vmem:[%s7637_s7 + $0x5c0] ss:$16 sps:$4 sm:$0xff]   ;;  %v6752_v3 = vld [vmem:[%s7637_s7 + $0x5c8] ss:$16 sps:$4 sm:$0xff]  }
  0xb1   : > { %1135 = vmatpush1.bf16.msra.mxu0 %v6659_v4  ;;  %1217 = vmatpush1.bf16.msra.mxu1 %v6662_v5  ;;  %v6757_v4 = vld [vmem:[%s7637_s7 + $0x5e4] ss:$16 sps:$4 sm:$0xff]   ;;  %v6760_v5 = vld [vmem:[%s7637_s7 + $0x5ec] ss:$16 sps:$4 sm:$0xff]  }
  0xb2   : > { %2020 = vmatprep.subr.bf16.mxu0 %v6667_v7  ;;  %2102 = vmatprep.subr.bf16.mxu1 %v6670_v8  ;;  %v6758_v7 = vld [vmem:[%s7637_s7 + $0x5e8] ss:$16 sps:$4 sm:$0xff]   ;;  %v6763_v8 = vld [vmem:[%s7637_s7 + $0x604] ss:$16 sps:$4 sm:$0xff]  }
  0xb4   : > { %1137 = vmatmul.mubr.bf16.vlgmr.msra.gmra.mrb[0].mxu0 %v277_v11  ;;  %1219 = vmatmul.mubr.bf16.vlgmr.msra.gmra.mrb[0].mxu1 %v277_v11 }
  0xb5   : > { %2021 = vmatpush1.bf16.msra.mxu0 %v6665_v9  ;;  %2103 = vmatpush1.bf16.msra.mxu1 %v6668_v10  ;;  %v6766_v9 = vld [vmem:[%s7637_s7 + $0x60c] ss:$16 sps:$4 sm:$0xff]   ;;  %v407_v10 = vlaneseq }
  0xb6   : > { %2022 = vmatprep.subr.bf16.mxu0 %v6673_v12  ;;  %2104 = vmatprep.subr.bf16.mxu1 %v6676_v13  ;;  %v7863_v13 = vld [vmem:[%s7857_s10] sm:$0x1f] }
  0xb7   : > { %v7851_v11 = vshrl.u32 %v407_v10, 7  ;;  %v6823_v10 = vld [vmem:[%s7637_s7 + $0x744] ss:$16 sps:$4 sm:$0xff]  }
  0xb9   : > { %2023 = vmatpush1.bf16.msra.mxu0 %v6671_v14  ;;  %2105 = vmatpush1.bf16.msra.mxu1 %v6674_v15  ;;  %v7860_v12 = vsub.s32 0, %v7851_v11  ;;  %v7866_v14 = vld [vmem:[%s7857_s10 + $0x8] sm:$0x1f]  ;;  %v7869_v15 = vld [vmem:[%s7857_s10 + $0x18] sm:$0x1f] }
  0xba   : > { %2024 = vmatprep.subr.bf16.mxu0 %v6679_v16  ;;  %2106 = vmatprep.subr.bf16.mxu1 %v6682_v17 }
  0xbb   : > { %v410_v16 = vrot.slane %v7863_v13, %v7860_v12  ;;  %v414_v17 = vrot.slane %v7866_v14, %v7860_v12 }
  0xbd   : > { %2025 = vmatpush1.bf16.msra.mxu0 %v6677_v18  ;;  %2107 = vmatpush1.bf16.msra.mxu1 %v6680_v19  ;;  %v422_v18 = vrot.slane %v7869_v15, %v7860_v12 }
  0xbe   : > { %2026 = vmatprep.subr.bf16.mxu0 %v6685_v20  ;;  %2108 = vmatprep.subr.bf16.mxu1 %v6688_v21 }
  0xc1   : > { %2027 = vmatpush1.bf16.msra.mxu0 %v6683_v22  ;;  %2109 = vmatpush1.bf16.msra.mxu1 %v6686_v23 }
  0xc2   : > { %2028 = vmatprep.subr.bf16.mxu0 %v6691_v24  ;;  %2110 = vmatprep.subr.bf16.mxu1 %v6694_v25 }
  0xc5   : > { %2029 = vmatpush1.bf16.msra.mxu0 %v6689_v26  ;;  %2111 = vmatpush1.bf16.msra.mxu1 %v6692_v27 }
  0xc6   : > { %2030 = vmatprep.subr.bf16.mxu0 %v6697_v28  ;;  %2112 = vmatprep.subr.bf16.mxu1 %v6700_v29 }
  0xc9   : > { %2031 = vmatpush1.bf16.msra.mxu0 %v6695_v30  ;;  %2113 = vmatpush1.bf16.msra.mxu1 %v6698_v31 }
  0xca   : > { %2032 = vmatprep.subr.bf16.mxu0 %v6703_v32  ;;  %2114 = vmatprep.subr.bf16.mxu1 %v6706_v33 }
  0xcd   : > { %2033 = vmatpush1.bf16.msra.mxu0 %v6701_v34  ;;  %2115 = vmatpush1.bf16.msra.mxu1 %v6704_v35  ;;  %v6761_v34 = vld [vmem:[%s7637_s7 + $0x600] ss:$16 sps:$4 sm:$0xff]   ;;  %v6764_v35 = vld [vmem:[%s7637_s7 + $0x608] ss:$16 sps:$4 sm:$0xff]  }
  0xce   : > { %2034 = vmatprep.subr.bf16.mxu0 %v6709_v36  ;;  %2116 = vmatprep.subr.bf16.mxu1 %v6712_v37  ;;  %v6769_v37 = vld [vmem:[%s7637_s7 + $0x624] ss:$16 sps:$4 sm:$0xff]  }
  0xd1   : > { %2035 = vmatpush1.bf16.msra.mxu0 %v6707_v38  ;;  %2117 = vmatpush1.bf16.msra.mxu1 %v6710_v39  ;;  %v6772_v38 = vld [vmem:[%s7637_s7 + $0x62c] ss:$16 sps:$4 sm:$0xff]  }
  0xd2   : > { %2036 = vmatprep.subr.bf16.mxu0 %v6715_v40  ;;  %2118 = vmatprep.subr.bf16.mxu1 %v6718_v41  ;;  %v6767_v40 = vld [vmem:[%s7637_s7 + $0x620] ss:$16 sps:$4 sm:$0xff]   ;;  %v6770_v41 = vld [vmem:[%s7637_s7 + $0x628] ss:$16 sps:$4 sm:$0xff]  }
  0xd5   : > { %2037 = vmatpush1.bf16.msra.mxu0 %v6713_v42  ;;  %2119 = vmatpush1.bf16.msra.mxu1 %v6716_v43  ;;  %v6775_v42 = vld [vmem:[%s7637_s7 + $0x644] ss:$16 sps:$4 sm:$0xff]   ;;  %v6778_v43 = vld [vmem:[%s7637_s7 + $0x64c] ss:$16 sps:$4 sm:$0xff]  }
  0xd6   : > { %2038 = vmatprep.subr.bf16.mxu0 %v6721_v44  ;;  %2120 = vmatprep.subr.bf16.mxu1 %v6724_v45  ;;  %v6773_v44 = vld [vmem:[%s7637_s7 + $0x640] ss:$16 sps:$4 sm:$0xff]   ;;  %v6776_v45 = vld [vmem:[%s7637_s7 + $0x648] ss:$16 sps:$4 sm:$0xff]  }
  0xd9   : > { %2039 = vmatpush1.bf16.msra.mxu0 %v6719_v46  ;;  %2121 = vmatpush1.bf16.msra.mxu1 %v6722_v47  ;;  %v6781_v46 = vld [vmem:[%s7637_s7 + $0x664] ss:$16 sps:$4 sm:$0xff]   ;;  %v6784_v47 = vld [vmem:[%s7637_s7 + $0x66c] ss:$16 sps:$4 sm:$0xff]  }
  0xda   : > { %2040 = vmatprep.subr.bf16.mxu0 %v6727_v48  ;;  %2122 = vmatprep.subr.bf16.mxu1 %v6730_v49  ;;  %v6779_v48 = vld [vmem:[%s7637_s7 + $0x660] ss:$16 sps:$4 sm:$0xff]   ;;  %v6782_v49 = vld [vmem:[%s7637_s7 + $0x668] ss:$16 sps:$4 sm:$0xff]  }
  0xdd   : > { %2041 = vmatpush1.bf16.msra.mxu0 %v6725_v50  ;;  %2123 = vmatpush1.bf16.msra.mxu1 %v6728_v51  ;;  %v6787_v50 = vld [vmem:[%s7637_s7 + $0x684] ss:$16 sps:$4 sm:$0xff]   ;;  %v6790_v51 = vld [vmem:[%s7637_s7 + $0x68c] ss:$16 sps:$4 sm:$0xff]  }
  0xde   : > { %2042 = vmatprep.subr.bf16.mxu0 %v6733_v52  ;;  %2124 = vmatprep.subr.bf16.mxu1 %v6736_v53  ;;  %v6785_v52 = vld [vmem:[%s7637_s7 + $0x680] ss:$16 sps:$4 sm:$0xff]   ;;  %v6788_v53 = vld [vmem:[%s7637_s7 + $0x688] ss:$16 sps:$4 sm:$0xff]  }
  0xe1   : > { %2043 = vmatpush1.bf16.msra.mxu0 %v6731_v54  ;;  %2125 = vmatpush1.bf16.msra.mxu1 %v6734_v55  ;;  %v6793_v54 = vld [vmem:[%s7637_s7 + $0x6a4] ss:$16 sps:$4 sm:$0xff]   ;;  %v6796_v55 = vld [vmem:[%s7637_s7 + $0x6ac] ss:$16 sps:$4 sm:$0xff]  }
  0xe2   : > { %2044 = vmatprep.subr.bf16.mxu0 %v6739_v56  ;;  %2126 = vmatprep.subr.bf16.mxu1 %v6742_v57  ;;  %v6791_v56 = vld [vmem:[%s7637_s7 + $0x6a0] ss:$16 sps:$4 sm:$0xff]   ;;  %v6794_v57 = vld [vmem:[%s7637_s7 + $0x6a8] ss:$16 sps:$4 sm:$0xff]  }
  0xe5   : > { %2045 = vmatpush1.bf16.msra.mxu0 %v6737_v58  ;;  %2127 = vmatpush1.bf16.msra.mxu1 %v6740_v59  ;;  %v6799_v58 = vld [vmem:[%s7637_s7 + $0x6c4] ss:$16 sps:$4 sm:$0xff]   ;;  %v6802_v59 = vld [vmem:[%s7637_s7 + $0x6cc] ss:$16 sps:$4 sm:$0xff]  }
  0xe6   : > { %2046 = vmatprep.subr.bf16.mxu0 %v6745_v60  ;;  %2128 = vmatprep.subr.bf16.mxu1 %v6748_v61  ;;  %v6797_v60 = vld [vmem:[%s7637_s7 + $0x6c0] ss:$16 sps:$4 sm:$0xff]   ;;  %v6800_v61 = vld [vmem:[%s7637_s7 + $0x6c8] ss:$16 sps:$4 sm:$0xff]  }
  0xe9   : > { %2047 = vmatpush1.bf16.msra.mxu0 %v6743_v62  ;;  %2129 = vmatpush1.bf16.msra.mxu1 %v6746_v63  ;;  %v6805_v62 = vld [vmem:[%s7637_s7 + $0x6e4] ss:$16 sps:$4 sm:$0xff]   ;;  %v6808_v63 = vld [vmem:[%s7637_s7 + $0x6ec] ss:$16 sps:$4 sm:$0xff]  }
  0xea   : > { %2048 = vmatprep.subr.bf16.mxu0 %v6751_v0  ;;  %2130 = vmatprep.subr.bf16.mxu1 %v6754_v1  ;;  %v6803_v0 = vld [vmem:[%s7637_s7 + $0x6e0] ss:$16 sps:$4 sm:$0xff]   ;;  %v6806_v1 = vld [vmem:[%s7637_s7 + $0x6e8] ss:$16 sps:$4 sm:$0xff]  }
  0xed   : > { %2049 = vmatpush1.bf16.msra.mxu0 %v6749_v2  ;;  %2131 = vmatpush1.bf16.msra.mxu1 %v6752_v3  ;;  %v6811_v2 = vld [vmem:[%s7637_s7 + $0x704] ss:$16 sps:$4 sm:$0xff]   ;;  %v6814_v3 = vld [vmem:[%s7637_s7 + $0x70c] ss:$16 sps:$4 sm:$0xff]  }
  0xee   : > { %2050 = vmatprep.subr.bf16.mxu0 %v6757_v4  ;;  %2132 = vmatprep.subr.bf16.mxu1 %v6760_v5  ;;  %v6809_v4 = vld [vmem:[%s7637_s7 + $0x700] ss:$16 sps:$4 sm:$0xff]   ;;  %v6812_v5 = vld [vmem:[%s7637_s7 + $0x708] ss:$16 sps:$4 sm:$0xff]  }
  0xf1   : > { %2051 = vmatpush1.bf16.msra.mxu0 %v6755_v6  ;;  %2133 = vmatpush1.bf16.msra.mxu1 %v6758_v7  ;;  %v6817_v6 = vld [vmem:[%s7637_s7 + $0x724] ss:$16 sps:$4 sm:$0xff]   ;;  %v6820_v7 = vld [vmem:[%s7637_s7 + $0x72c] ss:$16 sps:$4 sm:$0xff]  }
  0xf2   : > { %2061 = vmatprep.subr.bf16.mxu0 %v6763_v8  ;;  %2143 = vmatprep.subr.bf16.mxu1 %v6766_v9  ;;  %v6815_v8 = vld [vmem:[%s7637_s7 + $0x720] ss:$16 sps:$4 sm:$0xff]   ;;  %v6818_v9 = vld [vmem:[%s7637_s7 + $0x728] ss:$16 sps:$4 sm:$0xff]  }
 0x187   : > { %v1138_v19 = vpop.f32.mrb[0].mxu0  ;;  %v7877_v20 = vpop.f32.mrb[0].mxu1 }
 0x188   : > { %v6365_v21 = vadd.f32 %v1138_v19, %v410_v16  ;;  %v1140_v22 = vpop.f32.mrb[1].mxu0  ;;  %v1222_v23 = vpop.f32.mrb[1].mxu1  ;;  %v6826_v16 = vld [vmem:[%s7637_s7 + $0x74c] ss:$16 sps:$4 sm:$0xff]   ;;  %v6829_v19 = vld [vmem:[%s7637_s7 + $0x764] ss:$16 sps:$4 sm:$0xff]  }
 0x189   : > { %v6366_v24 = vadd.f32 %v1140_v22, %v414_v17  ;;  %v6368_v25 = vadd.f32 %v1222_v23, %v422_v18  ;;  %v1142_v26 = vpop.f32.mrb[2].mxu0  ;;  %v1224_v27 = vpop.f32.mrb[2].mxu1  ;;  %v6821_v17 = vld [vmem:[%s7637_s7 + $0x740] ss:$16 sps:$4 sm:$0xff]   ;;  %v6824_v18 = vld [vmem:[%s7637_s7 + $0x748] ss:$16 sps:$4 sm:$0xff]  }
 0x18a   : > { %v1227_v28 = vmax.f32 %v6365_v21, 0.0  ;;  %v1143_v29 = vpop.f32.mrb[3].mxu0  ;;  %v1225_v30 = vpop.f32.mrb[3].mxu1  ;;  %v6832_v21 = vld [vmem:[%s7637_s7 + $0x76c] ss:$16 sps:$4 sm:$0xff]  }
 0x18b   : > { %v1228_v31 = vmax.f32 %v6366_v24, 0.0  ;;  %v1230_v32 = vmax.f32 %v6368_v25, 0.0  ;;  %v6827_v22 = vld [vmem:[%s7637_s7 + $0x760] ss:$16 sps:$4 sm:$0xff]   ;;  %v6830_v23 = vld [vmem:[%s7637_s7 + $0x768] ss:$16 sps:$4 sm:$0xff]  }
 0x18c   : > { %v1231_v36 = vpack.c.bf16 %v1227_v28, %v1227_v28  ;;  %v6835_v24 = vld [vmem:[%s7637_s7 + $0x784] ss:$16 sps:$4 sm:$0xff]   ;;  %v6838_v25 = vld [vmem:[%s7637_s7 + $0x78c] ss:$16 sps:$4 sm:$0xff]   ;;  %v6833_v26 = vld [vmem:[%s7637_s7 + $0x780] ss:$16 sps:$4 sm:$0xff]  }
 0x18d   : > { %v1232_v33 = vpack.c.bf16 %v1228_v31, %v1228_v31  ;;  %v1234_v39 = vpack.c.bf16 %v1230_v32, %v1230_v32  ;;  %v6836_v27 = vld [vmem:[%s7637_s7 + $0x788] ss:$16 sps:$4 sm:$0xff]   ;;  %v6841_v28 = vld [vmem:[%s7637_s7 + $0x7a4] ss:$16 sps:$4 sm:$0xff]   ;;  %v6844_v29 = vld [vmem:[%s7637_s7 + $0x7ac] ss:$16 sps:$4 sm:$0xff]  }
 0x18e   : > { %v7932_v30 = vld [vmem:[%s7857_s10 + $0x10] sm:$0x1f]  ;;  %v6842_v32 = vld [vmem:[%s7637_s7 + $0x7a8] ss:$16 sps:$4 sm:$0xff]  }
 0x18f   : > { %2052 = vmatprep.mubr.bf16.mxu0 %v1232_v33  ;;  %2134 = vmatprep.mubr.bf16.mxu1 %v1232_v33  ;;  %v6839_v31 = vld [vmem:[%s7637_s7 + $0x7a0] ss:$16 sps:$4 sm:$0xff]   ;;  %v418_v33 = vrot.slane %v7932_v30, %v7860_v12  ;;  %v6856_v12 = vld [vmem:[%s7637_s7 + $0x7ec] ss:$16 sps:$4 sm:$0xff]  }
 0x190   : > { %2053 = vmatmul.mubr.bf16.vlgmr.msra.gmra.mrb[4].mxu0 %v1231_v36  ;;  %2135 = vmatmul.mubr.bf16.vlgmr.msra.gmra.mrb[4].mxu1 %v1231_v36  ;;  %v6845_v36 = vld [vmem:[%s7637_s7 + $0x7c0] ss:$16 sps:$4 sm:$0xff]  }
 0x191   : > { %2062 = vmatpush1.bf16.msra.mxu0 %v6761_v34  ;;  %2144 = vmatpush1.bf16.msra.mxu1 %v6764_v35  ;;  %v6847_v34 = vld [vmem:[%s7637_s7 + $0x7c4] ss:$16 sps:$4 sm:$0xff]   ;;  %v6850_v35 = vld [vmem:[%s7637_s7 + $0x7cc] ss:$16 sps:$4 sm:$0xff]  }
 0x192   : > { %2093 = vmatprep.mubr.bf16.mxu0 %v1234_v39  ;;  %2175 = vmatprep.mubr.bf16.mxu1 %v1234_v39  ;;  %v6853_v39 = vld [vmem:[%s7637_s7 + $0x7e4] ss:$16 sps:$4 sm:$0xff]  }
 0x193   : > { %2063 = vmatprep.subr.bf16.mxu0 %v6769_v37  ;;  %2145 = vmatprep.subr.bf16.mxu1 %v6772_v38  ;;  %v6848_v37 = vld [vmem:[%s7637_s7 + $0x7c8] ss:$16 sps:$4 sm:$0xff]   ;;  %v6367_v38 = vadd.f32 %v7877_v20, %v418_v33  ;;  %v6857_v20 = vld [vmem:[%s7637_s7 + $0x800] ss:$16 sps:$4 sm:$0xff]  }
 0x194   : > { %v6926_v33 = vld [vmem:[%s7637_s7 + $0x968] ss:$16 sps:$4 sm:$0xff]  }
 0x195   : > { %2064 = vmatpush1.bf16.msra.mxu0 %v6767_v40  ;;  %2146 = vmatpush1.bf16.msra.mxu1 %v6770_v41  ;;  %v6851_v40 = vld [vmem:[%s7637_s7 + $0x7e0] ss:$16 sps:$4 sm:$0xff]   ;;  %v6854_v41 = vld [vmem:[%s7637_s7 + $0x7e8] ss:$16 sps:$4 sm:$0xff]  }
 0x196   : > { %2065 = vmatprep.subr.bf16.mxu0 %v6775_v42  ;;  %2147 = vmatprep.subr.bf16.mxu1 %v6778_v43  ;;  %v1229_v42 = vmax.f32 %v6367_v38, 0.0  ;;  %v6859_v43 = vld [vmem:[%s7637_s7 + $0x804] ss:$16 sps:$4 sm:$0xff]  }
 0x197   : > { %v6937_v38 = vld [vmem:[%s7637_s7 + $0x9a4] ss:$16 sps:$4 sm:$0xff]  }
 0x199   : > { %2066 = vmatpush1.bf16.msra.mxu0 %v6773_v44  ;;  %2148 = vmatpush1.bf16.msra.mxu1 %v6776_v45  ;;  %v6862_v44 = vld [vmem:[%s7637_s7 + $0x80c] ss:$16 sps:$4 sm:$0xff]   ;;  %v6860_v45 = vld [vmem:[%s7637_s7 + $0x808] ss:$16 sps:$4 sm:$0xff]  }
 0x19a   : > { %2067 = vmatprep.subr.bf16.mxu0 %v6781_v46  ;;  %2149 = vmatprep.subr.bf16.mxu1 %v6784_v47  ;;  %v1233_v46 = vpack.c.bf16 %v1229_v42, %v1229_v42  ;;  %v6865_v47 = vld [vmem:[%s7637_s7 + $0x824] ss:$16 sps:$4 sm:$0xff]   ;;  %v6946_v42 = vld [vmem:[%s7637_s7 + $0x9cc] ss:$16 sps:$4 sm:$0xff]  }
 0x19d   : > { %2068 = vmatpush1.bf16.msra.mxu0 %v6779_v48  ;;  %2150 = vmatpush1.bf16.msra.mxu1 %v6782_v49  ;;  %v6868_v48 = vld [vmem:[%s7637_s7 + $0x82c] ss:$16 sps:$4 sm:$0xff]   ;;  %v6863_v49 = vld [vmem:[%s7637_s7 + $0x820] ss:$16 sps:$4 sm:$0xff]  }
 0x19e   : > { %2069 = vmatprep.subr.bf16.mxu0 %v6787_v50  ;;  %2151 = vmatprep.subr.bf16.mxu1 %v6790_v51  ;;  %v6866_v50 = vld [vmem:[%s7637_s7 + $0x828] ss:$16 sps:$4 sm:$0xff]   ;;  %v6871_v51 = vld [vmem:[%s7637_s7 + $0x844] ss:$16 sps:$4 sm:$0xff]  }
 0x1a1   : > { %2070 = vmatpush1.bf16.msra.mxu0 %v6785_v52  ;;  %2152 = vmatpush1.bf16.msra.mxu1 %v6788_v53  ;;  %v6874_v52 = vld [vmem:[%s7637_s7 + $0x84c] ss:$16 sps:$4 sm:$0xff]   ;;  %v6869_v53 = vld [vmem:[%s7637_s7 + $0x840] ss:$16 sps:$4 sm:$0xff]  }
 0x1a2   : > { %2071 = vmatprep.subr.bf16.mxu0 %v6793_v54  ;;  %2153 = vmatprep.subr.bf16.mxu1 %v6796_v55  ;;  %v6872_v54 = vld [vmem:[%s7637_s7 + $0x848] ss:$16 sps:$4 sm:$0xff]   ;;  %v6877_v55 = vld [vmem:[%s7637_s7 + $0x864] ss:$16 sps:$4 sm:$0xff]  }
 0x1a5   : > { %2072 = vmatpush1.bf16.msra.mxu0 %v6791_v56  ;;  %2154 = vmatpush1.bf16.msra.mxu1 %v6794_v57  ;;  %v6880_v56 = vld [vmem:[%s7637_s7 + $0x86c] ss:$16 sps:$4 sm:$0xff]   ;;  %v6875_v57 = vld [vmem:[%s7637_s7 + $0x860] ss:$16 sps:$4 sm:$0xff]  }
 0x1a6   : > { %2073 = vmatprep.subr.bf16.mxu0 %v6799_v58  ;;  %2155 = vmatprep.subr.bf16.mxu1 %v6802_v59  ;;  %v6878_v58 = vld [vmem:[%s7637_s7 + $0x868] ss:$16 sps:$4 sm:$0xff]   ;;  %v6883_v59 = vld [vmem:[%s7637_s7 + $0x884] ss:$16 sps:$4 sm:$0xff]  }
 0x1a9   : > { %2074 = vmatpush1.bf16.msra.mxu0 %v6797_v60  ;;  %2156 = vmatpush1.bf16.msra.mxu1 %v6800_v61  ;;  %v6886_v60 = vld [vmem:[%s7637_s7 + $0x88c] ss:$16 sps:$4 sm:$0xff]   ;;  %v6881_v61 = vld [vmem:[%s7637_s7 + $0x880] ss:$16 sps:$4 sm:$0xff]  }
 0x1aa   : > { %2075 = vmatprep.subr.bf16.mxu0 %v6805_v62  ;;  %2157 = vmatprep.subr.bf16.mxu1 %v6808_v63  ;;  %v6884_v62 = vld [vmem:[%s7637_s7 + $0x888] ss:$16 sps:$4 sm:$0xff]   ;;  %v6889_v63 = vld [vmem:[%s7637_s7 + $0x8a4] ss:$16 sps:$4 sm:$0xff]  }
 0x1ad   : > { %2076 = vmatpush1.bf16.msra.mxu0 %v6803_v0  ;;  %2158 = vmatpush1.bf16.msra.mxu1 %v6806_v1  ;;  %v6892_v0 = vld [vmem:[%s7637_s7 + $0x8ac] ss:$16 sps:$4 sm:$0xff]   ;;  %v6887_v1 = vld [vmem:[%s7637_s7 + $0x8a0] ss:$16 sps:$4 sm:$0xff]  }
 0x1ae   : > { %2077 = vmatprep.subr.bf16.mxu0 %v6811_v2  ;;  %2159 = vmatprep.subr.bf16.mxu1 %v6814_v3  ;;  %v6890_v2 = vld [vmem:[%s7637_s7 + $0x8a8] ss:$16 sps:$4 sm:$0xff]   ;;  %v6895_v3 = vld [vmem:[%s7637_s7 + $0x8c4] ss:$16 sps:$4 sm:$0xff]  }
 0x1b1   : > { %2078 = vmatpush1.bf16.msra.mxu0 %v6809_v4  ;;  %2160 = vmatpush1.bf16.msra.mxu1 %v6812_v5  ;;  %v6898_v4 = vld [vmem:[%s7637_s7 + $0x8cc] ss:$16 sps:$4 sm:$0xff]   ;;  %v6893_v5 = vld [vmem:[%s7637_s7 + $0x8c0] ss:$16 sps:$4 sm:$0xff]  }
 0x1b2   : > { %2079 = vmatprep.subr.bf16.mxu0 %v6817_v6  ;;  %2161 = vmatprep.subr.bf16.mxu1 %v6820_v7  ;;  %v6896_v6 = vld [vmem:[%s7637_s7 + $0x8c8] ss:$16 sps:$4 sm:$0xff]   ;;  %v6901_v7 = vld [vmem:[%s7637_s7 + $0x8e4] ss:$16 sps:$4 sm:$0xff]  }
 0x1b5   : > { %2080 = vmatpush1.bf16.msra.mxu0 %v6815_v8  ;;  %2162 = vmatpush1.bf16.msra.mxu1 %v6818_v9  ;;  %v6904_v8 = vld [vmem:[%s7637_s7 + $0x8ec] ss:$16 sps:$4 sm:$0xff]   ;;  %v6899_v9 = vld [vmem:[%s7637_s7 + $0x8e0] ss:$16 sps:$4 sm:$0xff]  }
 0x1b6   : > { %2081 = vmatprep.subr.bf16.mxu0 %v6823_v10  ;;  %2163 = vmatprep.subr.bf16.mxu1 %v6826_v16  ;;  %v6902_v10 = vld [vmem:[%s7637_s7 + $0x8e8] ss:$16 sps:$4 sm:$0xff]   ;;  %v6907_v16 = vld [vmem:[%s7637_s7 + $0x904] ss:$16 sps:$4 sm:$0xff]  }
 0x1b9   : > { %2082 = vmatpush1.bf16.msra.mxu0 %v6821_v17  ;;  %2164 = vmatpush1.bf16.msra.mxu1 %v6824_v18  ;;  %v6910_v17 = vld [vmem:[%s7637_s7 + $0x90c] ss:$16 sps:$4 sm:$0xff]   ;;  %v6905_v18 = vld [vmem:[%s7637_s7 + $0x900] ss:$16 sps:$4 sm:$0xff]  }
 0x1ba   : > { %2083 = vmatprep.subr.bf16.mxu0 %v6829_v19  ;;  %2165 = vmatprep.subr.bf16.mxu1 %v6832_v21  ;;  %v6908_v19 = vld [vmem:[%s7637_s7 + $0x908] ss:$16 sps:$4 sm:$0xff]   ;;  %v6913_v21 = vld [vmem:[%s7637_s7 + $0x924] ss:$16 sps:$4 sm:$0xff]  }
 0x1bd   : > { %2084 = vmatpush1.bf16.msra.mxu0 %v6827_v22  ;;  %2166 = vmatpush1.bf16.msra.mxu1 %v6830_v23  ;;  %v6916_v22 = vld [vmem:[%s7637_s7 + $0x92c] ss:$16 sps:$4 sm:$0xff]   ;;  %v6911_v23 = vld [vmem:[%s7637_s7 + $0x920] ss:$16 sps:$4 sm:$0xff]  }
 0x1be   : > { %2085 = vmatprep.subr.bf16.mxu0 %v6835_v24  ;;  %2167 = vmatprep.subr.bf16.mxu1 %v6838_v25  ;;  %v6914_v24 = vld [vmem:[%s7637_s7 + $0x928] ss:$16 sps:$4 sm:$0xff]   ;;  %v6919_v25 = vld [vmem:[%s7637_s7 + $0x944] ss:$16 sps:$4 sm:$0xff]  }
 0x1c1   : > { %2086 = vmatpush1.bf16.msra.mxu0 %v6833_v26  ;;  %2168 = vmatpush1.bf16.msra.mxu1 %v6836_v27  ;;  %v6922_v26 = vld [vmem:[%s7637_s7 + $0x94c] ss:$16 sps:$4 sm:$0xff]   ;;  %v6917_v27 = vld [vmem:[%s7637_s7 + $0x940] ss:$16 sps:$4 sm:$0xff]  }
 0x1c2   : > { %2087 = vmatprep.subr.bf16.mxu0 %v6841_v28  ;;  %2169 = vmatprep.subr.bf16.mxu1 %v6844_v29  ;;  %v6920_v28 = vld [vmem:[%s7637_s7 + $0x948] ss:$16 sps:$4 sm:$0xff]   ;;  %v6925_v29 = vld [vmem:[%s7637_s7 + $0x964] ss:$16 sps:$4 sm:$0xff]  }
 0x1c5   : > { %2088 = vmatpush1.bf16.msra.mxu0 %v6839_v31  ;;  %2170 = vmatpush1.bf16.msra.mxu1 %v6842_v32  ;;  %v6928_v31 = vld [vmem:[%s7637_s7 + $0x96c] ss:$16 sps:$4 sm:$0xff]   ;;  %v6923_v32 = vld [vmem:[%s7637_s7 + $0x960] ss:$16 sps:$4 sm:$0xff]  }
 0x1c6   : > { %2089 = vmatprep.subr.bf16.mxu0 %v6847_v34  ;;  %2171 = vmatprep.subr.bf16.mxu1 %v6850_v35  ;;  %v6931_v34 = vld [vmem:[%s7637_s7 + $0x984] ss:$16 sps:$4 sm:$0xff]   ;;  %v6934_v35 = vld [vmem:[%s7637_s7 + $0x98c] ss:$16 sps:$4 sm:$0xff]  }
 0x1c9   : > { %2090 = vmatpush1.bf16.msra.mxu0 %v6845_v36  ;;  %2172 = vmatpush1.bf16.msra.mxu1 %v6848_v37  ;;  %v6929_v36 = vld [vmem:[%s7637_s7 + $0x980] ss:$16 sps:$4 sm:$0xff]   ;;  %v6932_v37 = vld [vmem:[%s7637_s7 + $0x988] ss:$16 sps:$4 sm:$0xff]  }
 0x1ca   : > { %2091 = vmatprep.subr.bf16.mxu0 %v6853_v39  ;;  %2173 = vmatprep.subr.bf16.mxu1 %v6856_v12  ;;  %v6940_v39 = vld [vmem:[%s7637_s7 + $0x9ac] ss:$16 sps:$4 sm:$0xff]   ;;  %v6935_v12 = vld [vmem:[%s7637_s7 + $0x9a0] ss:$16 sps:$4 sm:$0xff]  }
 0x1cd   : > { %2092 = vmatpush1.bf16.msra.mxu0 %v6851_v40  ;;  %2174 = vmatpush1.bf16.msra.mxu1 %v6854_v41  ;;  %v6938_v40 = vld [vmem:[%s7637_s7 + $0x9a8] ss:$16 sps:$4 sm:$0xff]   ;;  %v6943_v41 = vld [vmem:[%s7637_s7 + $0x9c4] ss:$16 sps:$4 sm:$0xff]  }
 0x1ce   : > { %2977 = vmatprep.subr.bf16.mxu0 %v6859_v43  ;;  %3059 = vmatprep.subr.bf16.mxu1 %v6862_v44  ;;  %v6941_v43 = vld [vmem:[%s7637_s7 + $0x9c0] ss:$16 sps:$4 sm:$0xff]   ;;  %v6944_v44 = vld [vmem:[%s7637_s7 + $0x9c8] ss:$16 sps:$4 sm:$0xff]  }
 0x1d0   : > { %2094 = vmatmul.mubr.bf16.vlgmr.msra.gmra.mrb[4].mxu0 %v1233_v46  ;;  %2176 = vmatmul.mubr.bf16.vlgmr.msra.gmra.mrb[4].mxu1 %v1233_v46  ;;  %v6947_v46 = vld [vmem:[%s7637_s7 + $0x9e0] ss:$16 sps:$4 sm:$0xff]  }
 0x1d1   : > { %2978 = vmatpush1.bf16.msra.mxu0 %v6857_v20  ;;  %3060 = vmatpush1.bf16.msra.mxu1 %v6860_v45  ;;  %v6949_v20 = vld [vmem:[%s7637_s7 + $0x9e4] ss:$16 sps:$4 sm:$0xff]   ;;  %v6952_v45 = vld [vmem:[%s7637_s7 + $0x9ec] ss:$16 sps:$4 sm:$0xff]  }
 0x1d2   : > { %2979 = vmatprep.subr.bf16.mxu0 %v6865_v47  ;;  %3061 = vmatprep.subr.bf16.mxu1 %v6868_v48  ;;  %v6950_v47 = vld [vmem:[%s7637_s7 + $0x9e8] ss:$16 sps:$4 sm:$0xff]   ;;  %v6955_v48 = vld [vmem:[%s7637_s7 + $0xa04] ss:$16 sps:$4 sm:$0xff]  }
 0x1d5   : > { %2980 = vmatpush1.bf16.msra.mxu0 %v6863_v49  ;;  %3062 = vmatpush1.bf16.msra.mxu1 %v6866_v50  ;;  %v6958_v49 = vld [vmem:[%s7637_s7 + $0xa0c] ss:$16 sps:$4 sm:$0xff]   ;;  %v8014_v50 = vsub.s32 1, %v7851_v11 }
 0x1d6   : > { %2981 = vmatprep.subr.bf16.mxu0 %v6871_v51  ;;  %3063 = vmatprep.subr.bf16.mxu1 %v6874_v52 }
 0x1d7   : > { %v1367_v51 = vrot.slane %v7863_v13, %v8014_v50  ;;  %v1371_v52 = vrot.slane %v7866_v14, %v8014_v50 }
 0x1d9   : > { %2982 = vmatpush1.bf16.msra.mxu0 %v6869_v53  ;;  %3064 = vmatpush1.bf16.msra.mxu1 %v6872_v54  ;;  %v1379_v53 = vrot.slane %v7869_v15, %v8014_v50 }
 0x1da   : > { %2983 = vmatprep.subr.bf16.mxu0 %v6877_v55  ;;  %3065 = vmatprep.subr.bf16.mxu1 %v6880_v56 }
 0x1dd   : > { %2984 = vmatpush1.bf16.msra.mxu0 %v6875_v57  ;;  %3066 = vmatpush1.bf16.msra.mxu1 %v6878_v58 }
 0x1de   : > { %2985 = vmatprep.subr.bf16.mxu0 %v6883_v59  ;;  %3067 = vmatprep.subr.bf16.mxu1 %v6886_v60 }
 0x1e1   : > { %2986 = vmatpush1.bf16.msra.mxu0 %v6881_v61  ;;  %3068 = vmatpush1.bf16.msra.mxu1 %v6884_v62 }
 0x1e2   : > { %2987 = vmatprep.subr.bf16.mxu0 %v6889_v63  ;;  %3069 = vmatprep.subr.bf16.mxu1 %v6892_v0 }
 0x1e5   : > { %2988 = vmatpush1.bf16.msra.mxu0 %v6887_v1  ;;  %3070 = vmatpush1.bf16.msra.mxu1 %v6890_v2  ;;  %v6953_v2 = vld [vmem:[%s7637_s7 + $0xa00] ss:$16 sps:$4 sm:$0xff]  }
 0x1e6   : > { %2989 = vmatprep.subr.bf16.mxu0 %v6895_v3  ;;  %3071 = vmatprep.subr.bf16.mxu1 %v6898_v4  ;;  %v6956_v3 = vld [vmem:[%s7637_s7 + $0xa08] ss:$16 sps:$4 sm:$0xff]  }
 0x1e9   : > { %2990 = vmatpush1.bf16.msra.mxu0 %v6893_v5  ;;  %3072 = vmatpush1.bf16.msra.mxu1 %v6896_v6  ;;  %v6961_v5 = vld [vmem:[%s7637_s7 + $0xa24] ss:$16 sps:$4 sm:$0xff]   ;;  %v6964_v6 = vld [vmem:[%s7637_s7 + $0xa2c] ss:$16 sps:$4 sm:$0xff]  }
 0x1ea   : > { %2991 = vmatprep.subr.bf16.mxu0 %v6901_v7  ;;  %3073 = vmatprep.subr.bf16.mxu1 %v6904_v8  ;;  %v6959_v8 = vld [vmem:[%s7637_s7 + $0xa20] ss:$16 sps:$4 sm:$0xff]  }
 0x1ed   : > { %2992 = vmatpush1.bf16.msra.mxu0 %v6899_v9  ;;  %3074 = vmatpush1.bf16.msra.mxu1 %v6902_v10  ;;  %v6962_v9 = vld [vmem:[%s7637_s7 + $0xa28] ss:$16 sps:$4 sm:$0xff]   ;;  %v6967_v10 = vld [vmem:[%s7637_s7 + $0xa44] ss:$16 sps:$4 sm:$0xff]  }
 0x1ee   : > { %2993 = vmatprep.subr.bf16.mxu0 %v6907_v16  ;;  %3075 = vmatprep.subr.bf16.mxu1 %v6910_v17  ;;  %v6970_v16 = vld [vmem:[%s7637_s7 + $0xa4c] ss:$16 sps:$4 sm:$0xff]   ;;  %v6965_v17 = vld [vmem:[%s7637_s7 + $0xa40] ss:$16 sps:$4 sm:$0xff]  }
 0x1f1   : > { %2994 = vmatpush1.bf16.msra.mxu0 %v6905_v18  ;;  %3076 = vmatpush1.bf16.msra.mxu1 %v6908_v19  ;;  %v6968_v18 = vld [vmem:[%s7637_s7 + $0xa48] ss:$16 sps:$4 sm:$0xff]   ;;  %v6973_v19 = vld [vmem:[%s7637_s7 + $0xa64] ss:$16 sps:$4 sm:$0xff]  }
 0x1f2   : > { %2995 = vmatprep.subr.bf16.mxu0 %v6913_v21  ;;  %3077 = vmatprep.subr.bf16.mxu1 %v6916_v22  ;;  %v6976_v21 = vld [vmem:[%s7637_s7 + $0xa6c] ss:$16 sps:$4 sm:$0xff]   ;;  %v6971_v22 = vld [vmem:[%s7637_s7 + $0xa60] ss:$16 sps:$4 sm:$0xff]  }
 0x1f5   : > { %2996 = vmatpush1.bf16.msra.mxu0 %v6911_v23  ;;  %3078 = vmatpush1.bf16.msra.mxu1 %v6914_v24  ;;  %v6974_v23 = vld [vmem:[%s7637_s7 + $0xa68] ss:$16 sps:$4 sm:$0xff]   ;;  %v6979_v24 = vld [vmem:[%s7637_s7 + $0xa84] ss:$16 sps:$4 sm:$0xff]  }
 0x1f6   : > { %2997 = vmatprep.subr.bf16.mxu0 %v6919_v25  ;;  %3079 = vmatprep.subr.bf16.mxu1 %v6922_v26  ;;  %v6982_v25 = vld [vmem:[%s7637_s7 + $0xa8c] ss:$16 sps:$4 sm:$0xff]   ;;  %v6977_v26 = vld [vmem:[%s7637_s7 + $0xa80] ss:$16 sps:$4 sm:$0xff]  }
 0x1f9   : > { %2998 = vmatpush1.bf16.msra.mxu0 %v6917_v27  ;;  %3080 = vmatpush1.bf16.msra.mxu1 %v6920_v28  ;;  %v6980_v27 = vld [vmem:[%s7637_s7 + $0xa88] ss:$16 sps:$4 sm:$0xff]   ;;  %v6985_v28 = vld [vmem:[%s7637_s7 + $0xaa4] ss:$16 sps:$4 sm:$0xff]  }
 0x1fa   : > { %2999 = vmatprep.subr.bf16.mxu0 %v6925_v29  ;;  %3081 = vmatprep.subr.bf16.mxu1 %v6928_v31  ;;  %v6988_v29 = vld [vmem:[%s7637_s7 + $0xaac] ss:$16 sps:$4 sm:$0xff]   ;;  %v6983_v31 = vld [vmem:[%s7637_s7 + $0xaa0] ss:$16 sps:$4 sm:$0xff]  }
 0x1fd   : > { %3000 = vmatpush1.bf16.msra.mxu0 %v6923_v32  ;;  %3082 = vmatpush1.bf16.msra.mxu1 %v6926_v33  ;;  %v6986_v32 = vld [vmem:[%s7637_s7 + $0xaa8] ss:$16 sps:$4 sm:$0xff]   ;;  %v6991_v33 = vld [vmem:[%s7637_s7 + $0xac4] ss:$16 sps:$4 sm:$0xff]  }
 0x1fe   : > { %3001 = vmatprep.subr.bf16.mxu0 %v6931_v34  ;;  %3083 = vmatprep.subr.bf16.mxu1 %v6934_v35  ;;  %v6994_v34 = vld [vmem:[%s7637_s7 + $0xacc] ss:$16 sps:$4 sm:$0xff]   ;;  %v6989_v35 = vld [vmem:[%s7637_s7 + $0xac0] ss:$16 sps:$4 sm:$0xff]  }
 0x201   : > { %3002 = vmatpush1.bf16.msra.mxu0 %v6929_v36  ;;  %3084 = vmatpush1.bf16.msra.mxu1 %v6932_v37  ;;  %v6992_v36 = vld [vmem:[%s7637_s7 + $0xac8] ss:$16 sps:$4 sm:$0xff]   ;;  %v6997_v37 = vld [vmem:[%s7637_s7 + $0xae4] ss:$16 sps:$4 sm:$0xff]  }
 0x202   : > { %3003 = vmatprep.subr.bf16.mxu0 %v6937_v38  ;;  %3085 = vmatprep.subr.bf16.mxu1 %v6940_v39  ;;  %v7000_v38 = vld [vmem:[%s7637_s7 + $0xaec] ss:$16 sps:$4 sm:$0xff]   ;;  %v6995_v39 = vld [vmem:[%s7637_s7 + $0xae0] ss:$16 sps:$4 sm:$0xff]  }
 0x205   : > { %3004 = vmatpush1.bf16.msra.mxu0 %v6935_v12  ;;  %3086 = vmatpush1.bf16.msra.mxu1 %v6938_v40  ;;  %v6998_v12 = vld [vmem:[%s7637_s7 + $0xae8] ss:$16 sps:$4 sm:$0xff]   ;;  %v7003_v40 = vld [vmem:[%s7637_s7 + $0xb04] ss:$16 sps:$4 sm:$0xff]  }
 0x206   : > { %3005 = vmatprep.subr.bf16.mxu0 %v6943_v41  ;;  %3087 = vmatprep.subr.bf16.mxu1 %v6946_v42  ;;  %v7006_v41 = vld [vmem:[%s7637_s7 + $0xb0c] ss:$16 sps:$4 sm:$0xff]   ;;  %v7001_v42 = vld [vmem:[%s7637_s7 + $0xb00] ss:$16 sps:$4 sm:$0xff]  }
 0x209   : > { %3006 = vmatpush1.bf16.msra.mxu0 %v6941_v43  ;;  %3088 = vmatpush1.bf16.msra.mxu1 %v6944_v44  ;;  %v7004_v43 = vld [vmem:[%s7637_s7 + $0xb08] ss:$16 sps:$4 sm:$0xff]   ;;  %v7009_v44 = vld [vmem:[%s7637_s7 + $0xb24] ss:$16 sps:$4 sm:$0xff]  }
 0x20a   : > { %3007 = vmatprep.subr.bf16.mxu0 %v6949_v20  ;;  %3089 = vmatprep.subr.bf16.mxu1 %v6952_v45  ;;  %v7012_v20 = vld [vmem:[%s7637_s7 + $0xb2c] ss:$16 sps:$4 sm:$0xff]   ;;  %v7007_v45 = vld [vmem:[%s7637_s7 + $0xb20] ss:$16 sps:$4 sm:$0xff]  }
 0x20d   : > { %3008 = vmatpush1.bf16.msra.mxu0 %v6947_v46  ;;  %3090 = vmatpush1.bf16.msra.mxu1 %v6950_v47  ;;  %v7010_v46 = vld [vmem:[%s7637_s7 + $0xb28] ss:$16 sps:$4 sm:$0xff]   ;;  %v7015_v47 = vld [vmem:[%s7637_s7 + $0xb44] ss:$16 sps:$4 sm:$0xff]  }
 0x20e   : > { %3018 = vmatprep.subr.bf16.mxu0 %v6955_v48  ;;  %3100 = vmatprep.subr.bf16.mxu1 %v6958_v49  ;;  %v7018_v48 = vld [vmem:[%s7637_s7 + $0xb4c] ss:$16 sps:$4 sm:$0xff]   ;;  %v7013_v49 = vld [vmem:[%s7637_s7 + $0xb40] ss:$16 sps:$4 sm:$0xff]  }
 0x2a3   : > { %v2095_v54 = vpop.f32.mrb[4].mxu0  ;;  %v8022_v55 = vpop.f32.mrb[4].mxu1 }
 0x2a4   : > { %v6369_v56 = vadd.f32 %v2095_v54, %v1367_v51  ;;  %v2097_v57 = vpop.f32.mrb[5].mxu0  ;;  %v2179_v58 = vpop.f32.mrb[5].mxu1  ;;  %v7016_v51 = vld [vmem:[%s7637_s7 + $0xb48] ss:$16 sps:$4 sm:$0xff]   ;;  %v7019_v54 = vld [vmem:[%s7637_s7 + $0xb60] ss:$16 sps:$4 sm:$0xff]  }
 0x2a5   : > { %v6370_v59 = vadd.f32 %v2097_v57, %v1371_v52  ;;  %v6372_v60 = vadd.f32 %v2179_v58, %v1379_v53  ;;  %v2099_v61 = vpop.f32.mrb[6].mxu0  ;;  %v2181_v13 = vpop.f32.mrb[6].mxu1  ;;  %v7021_v52 = vld [vmem:[%s7637_s7 + $0xb64] ss:$16 sps:$4 sm:$0xff]   ;;  %v7024_v53 = vld [vmem:[%s7637_s7 + $0xb6c] ss:$16 sps:$4 sm:$0xff]  }
 0x2a6   : > { %v2184_v62 = vmax.f32 %v6369_v56, 0.0  ;;  %v2100_v63 = vpop.f32.mrb[7].mxu0  ;;  %v2182_v14 = vpop.f32.mrb[7].mxu1  ;;  %v7022_v56 = vld [vmem:[%s7637_s7 + $0xb68] ss:$16 sps:$4 sm:$0xff]  }
 0x2a7   : > { %v2185_v0 = vmax.f32 %v6370_v59, 0.0  ;;  %v2187_v15 = vmax.f32 %v6372_v60, 0.0  ;;  %v7027_v57 = vld [vmem:[%s7637_s7 + $0xb84] ss:$16 sps:$4 sm:$0xff]   ;;  %v7030_v58 = vld [vmem:[%s7637_s7 + $0xb8c] ss:$16 sps:$4 sm:$0xff]   ;;  %v1375_v14 = vrot.slane %v7932_v30, %v8014_v50 }
 0x2a8   : > { %v2188_v4 = vpack.c.bf16 %v2184_v62, %v2184_v62  ;;  %v7025_v59 = vld [vmem:[%s7637_s7 + $0xb80] ss:$16 sps:$4 sm:$0xff]   ;;  %v7028_v60 = vld [vmem:[%s7637_s7 + $0xb88] ss:$16 sps:$4 sm:$0xff]   ;;  %v7033_v61 = vld [vmem:[%s7637_s7 + $0xba4] ss:$16 sps:$4 sm:$0xff]  }
 0x2a9   : > { %v2189_v1 = vpack.c.bf16 %v2185_v0, %v2185_v0  ;;  %v2191_v7 = vpack.c.bf16 %v2187_v15, %v2187_v15  ;;  %v7036_v13 = vld [vmem:[%s7637_s7 + $0xbac] ss:$16 sps:$4 sm:$0xff]   ;;  %v7031_v62 = vld [vmem:[%s7637_s7 + $0xba0] ss:$16 sps:$4 sm:$0xff]   ;;  %v7034_v63 = vld [vmem:[%s7637_s7 + $0xba8] ss:$16 sps:$4 sm:$0xff]  }
 0x2aa   : > { %v7039_v0 = vld [vmem:[%s7637_s7 + $0xbc4] ss:$16 sps:$4 sm:$0xff]   ;;  %v7042_v15 = vld [vmem:[%s7637_s7 + $0xbcc] ss:$16 sps:$4 sm:$0xff]   ;;  %v7043_v50 = vld [vmem:[%s7637_s7 + $0xbe0] ss:$16 sps:$4 sm:$0xff]  }
 0x2ab   : > { %3009 = vmatprep.mubr.bf16.mxu0 %v2189_v1  ;;  %3091 = vmatprep.mubr.bf16.mxu1 %v2189_v1  ;;  %v7037_v1 = vld [vmem:[%s7637_s7 + $0xbc0] ss:$16 sps:$4 sm:$0xff]   ;;  %v7048_v30 = vld [vmem:[%s7637_s7 + $0xbec] ss:$16 sps:$4 sm:$0xff]  }
 0x2ac   : > { %3010 = vmatmul.mubr.bf16.vlgmr.msra.gmra.mrb[8].mxu0 %v2188_v4  ;;  %3092 = vmatmul.mubr.bf16.vlgmr.msra.gmra.mrb[8].mxu1 %v2188_v4  ;;  %v7045_v4 = vld [vmem:[%s7637_s7 + $0xbe4] ss:$16 sps:$4 sm:$0xff]  }
 0x2ad   : > { %3019 = vmatpush1.bf16.msra.mxu0 %v6953_v2  ;;  %3101 = vmatpush1.bf16.msra.mxu1 %v6956_v3  ;;  %v7040_v2 = vld [vmem:[%s7637_s7 + $0xbc8] ss:$16 sps:$4 sm:$0xff]   ;;  %v6371_v3 = vadd.f32 %v8022_v55, %v1375_v14  ;;  %v7049_v55 = vld [vmem:[%s7637_s7 + $0xc00] ss:$16 sps:$4 sm:$0xff]  }
 0x2ae   : > { %3050 = vmatprep.mubr.bf16.mxu0 %v2191_v7  ;;  %3132 = vmatprep.mubr.bf16.mxu1 %v2191_v7  ;;  %v7051_v7 = vld [vmem:[%s7637_s7 + $0xc04] ss:$16 sps:$4 sm:$0xff]   ;;  %v7124_v14 = vld [vmem:[%s7637_s7 + $0xd88] ss:$16 sps:$4 sm:$0xff]  }
 0x2af   : > { %3020 = vmatprep.subr.bf16.mxu0 %v6961_v5  ;;  %3102 = vmatprep.subr.bf16.mxu1 %v6964_v6  ;;  %v7046_v5 = vld [vmem:[%s7637_s7 + $0xbe8] ss:$16 sps:$4 sm:$0xff]   ;;  %v2186_v6 = vmax.f32 %v6371_v3, 0.0  ;;  %v7135_v3 = vld [vmem:[%s7637_s7 + $0xdc4] ss:$16 sps:$4 sm:$0xff]  }
 0x2b1   : > { %3021 = vmatpush1.bf16.msra.mxu0 %v6959_v8  ;;  %3103 = vmatpush1.bf16.msra.mxu1 %v6962_v9  ;;  %v7054_v8 = vld [vmem:[%s7637_s7 + $0xc0c] ss:$16 sps:$4 sm:$0xff]   ;;  %v7052_v9 = vld [vmem:[%s7637_s7 + $0xc08] ss:$16 sps:$4 sm:$0xff]  }
 0x2b2   : > { %3022 = vmatprep.subr.bf16.mxu0 %v6967_v10  ;;  %3104 = vmatprep.subr.bf16.mxu1 %v6970_v16  ;;  %v2190_v10 = vpack.c.bf16 %v2186_v6, %v2186_v6  ;;  %v7057_v16 = vld [vmem:[%s7637_s7 + $0xc24] ss:$16 sps:$4 sm:$0xff]   ;;  %v7144_v6 = vld [vmem:[%s7637_s7 + $0xdec] ss:$16 sps:$4 sm:$0xff]  }
 0x2b5   : > { %3023 = vmatpush1.bf16.msra.mxu0 %v6965_v17  ;;  %3105 = vmatpush1.bf16.msra.mxu1 %v6968_v18  ;;  %v7060_v17 = vld [vmem:[%s7637_s7 + $0xc2c] ss:$16 sps:$4 sm:$0xff]   ;;  %v7055_v18 = vld [vmem:[%s7637_s7 + $0xc20] ss:$16 sps:$4 sm:$0xff]  }
 0x2b6   : > { %3024 = vmatprep.subr.bf16.mxu0 %v6973_v19  ;;  %3106 = vmatprep.subr.bf16.mxu1 %v6976_v21  ;;  %v7058_v19 = vld [vmem:[%s7637_s7 + $0xc28] ss:$16 sps:$4 sm:$0xff]   ;;  %v7063_v21 = vld [vmem:[%s7637_s7 + $0xc44] ss:$16 sps:$4 sm:$0xff]  }
 0x2b9   : > { %3025 = vmatpush1.bf16.msra.mxu0 %v6971_v22  ;;  %3107 = vmatpush1.bf16.msra.mxu1 %v6974_v23  ;;  %v7066_v22 = vld [vmem:[%s7637_s7 + $0xc4c] ss:$16 sps:$4 sm:$0xff]   ;;  %v7061_v23 = vld [vmem:[%s7637_s7 + $0xc40] ss:$16 sps:$4 sm:$0xff]  }
 0x2ba   : > { %3026 = vmatprep.subr.bf16.mxu0 %v6979_v24  ;;  %3108 = vmatprep.subr.bf16.mxu1 %v6982_v25  ;;  %v7064_v24 = vld [vmem:[%s7637_s7 + $0xc48] ss:$16 sps:$4 sm:$0xff]   ;;  %v7069_v25 = vld [vmem:[%s7637_s7 + $0xc64] ss:$16 sps:$4 sm:$0xff]  }
 0x2bd   : > { %3027 = vmatpush1.bf16.msra.mxu0 %v6977_v26  ;;  %3109 = vmatpush1.bf16.msra.mxu1 %v6980_v27  ;;  %v7072_v26 = vld [vmem:[%s7637_s7 + $0xc6c] ss:$16 sps:$4 sm:$0xff]   ;;  %v7067_v27 = vld [vmem:[%s7637_s7 + $0xc60] ss:$16 sps:$4 sm:$0xff]  }
 0x2be   : > { %3028 = vmatprep.subr.bf16.mxu0 %v6985_v28  ;;  %3110 = vmatprep.subr.bf16.mxu1 %v6988_v29  ;;  %v7070_v28 = vld [vmem:[%s7637_s7 + $0xc68] ss:$16 sps:$4 sm:$0xff]   ;;  %v7075_v29 = vld [vmem:[%s7637_s7 + $0xc84] ss:$16 sps:$4 sm:$0xff]  }
 0x2c1   : > { %3029 = vmatpush1.bf16.msra.mxu0 %v6983_v31  ;;  %3111 = vmatpush1.bf16.msra.mxu1 %v6986_v32  ;;  %v7078_v31 = vld [vmem:[%s7637_s7 + $0xc8c] ss:$16 sps:$4 sm:$0xff]   ;;  %v7073_v32 = vld [vmem:[%s7637_s7 + $0xc80] ss:$16 sps:$4 sm:$0xff]  }
 0x2c2   : > { %3030 = vmatprep.subr.bf16.mxu0 %v6991_v33  ;;  %3112 = vmatprep.subr.bf16.mxu1 %v6994_v34  ;;  %v7076_v33 = vld [vmem:[%s7637_s7 + $0xc88] ss:$16 sps:$4 sm:$0xff]   ;;  %v7081_v34 = vld [vmem:[%s7637_s7 + $0xca4] ss:$16 sps:$4 sm:$0xff]  }
 0x2c5   : > { %3031 = vmatpush1.bf16.msra.mxu0 %v6989_v35  ;;  %3113 = vmatpush1.bf16.msra.mxu1 %v6992_v36  ;;  %v7084_v35 = vld [vmem:[%s7637_s7 + $0xcac] ss:$16 sps:$4 sm:$0xff]   ;;  %v7079_v36 = vld [vmem:[%s7637_s7 + $0xca0] ss:$16 sps:$4 sm:$0xff]  }
 0x2c6   : > { %3032 = vmatprep.subr.bf16.mxu0 %v6997_v37  ;;  %3114 = vmatprep.subr.bf16.mxu1 %v7000_v38  ;;  %v7082_v37 = vld [vmem:[%s7637_s7 + $0xca8] ss:$16 sps:$4 sm:$0xff]   ;;  %v7087_v38 = vld [vmem:[%s7637_s7 + $0xcc4] ss:$16 sps:$4 sm:$0xff]  }
 0x2c9   : > { %3033 = vmatpush1.bf16.msra.mxu0 %v6995_v39  ;;  %3115 = vmatpush1.bf16.msra.mxu1 %v6998_v12  ;;  %v7090_v39 = vld [vmem:[%s7637_s7 + $0xccc] ss:$16 sps:$4 sm:$0xff]   ;;  %v7085_v12 = vld [vmem:[%s7637_s7 + $0xcc0] ss:$16 sps:$4 sm:$0xff]  }
 0x2ca   : > { %3034 = vmatprep.subr.bf16.mxu0 %v7003_v40  ;;  %3116 = vmatprep.subr.bf16.mxu1 %v7006_v41  ;;  %v7088_v40 = vld [vmem:[%s7637_s7 + $0xcc8] ss:$16 sps:$4 sm:$0xff]   ;;  %v7093_v41 = vld [vmem:[%s7637_s7 + $0xce4] ss:$16 sps:$4 sm:$0xff]  }
 0x2cd   : > { %3035 = vmatpush1.bf16.msra.mxu0 %v7001_v42  ;;  %3117 = vmatpush1.bf16.msra.mxu1 %v7004_v43  ;;  %v7096_v42 = vld [vmem:[%s7637_s7 + $0xcec] ss:$16 sps:$4 sm:$0xff]   ;;  %v7091_v43 = vld [vmem:[%s7637_s7 + $0xce0] ss:$16 sps:$4 sm:$0xff]  }
 0x2ce   : > { %3036 = vmatprep.subr.bf16.mxu0 %v7009_v44  ;;  %3118 = vmatprep.subr.bf16.mxu1 %v7012_v20  ;;  %v7094_v44 = vld [vmem:[%s7637_s7 + $0xce8] ss:$16 sps:$4 sm:$0xff]   ;;  %v7099_v20 = vld [vmem:[%s7637_s7 + $0xd04] ss:$16 sps:$4 sm:$0xff]  }
 0x2d1   : > { %3037 = vmatpush1.bf16.msra.mxu0 %v7007_v45  ;;  %3119 = vmatpush1.bf16.msra.mxu1 %v7010_v46  ;;  %v7102_v45 = vld [vmem:[%s7637_s7 + $0xd0c] ss:$16 sps:$4 sm:$0xff]   ;;  %v7097_v46 = vld [vmem:[%s7637_s7 + $0xd00] ss:$16 sps:$4 sm:$0xff]  }
 0x2d2   : > { %3038 = vmatprep.subr.bf16.mxu0 %v7015_v47  ;;  %3120 = vmatprep.subr.bf16.mxu1 %v7018_v48  ;;  %v7100_v47 = vld [vmem:[%s7637_s7 + $0xd08] ss:$16 sps:$4 sm:$0xff]   ;;  %v7105_v48 = vld [vmem:[%s7637_s7 + $0xd24] ss:$16 sps:$4 sm:$0xff]  }
 0x2d5   : > { %3039 = vmatpush1.bf16.msra.mxu0 %v7013_v49  ;;  %3121 = vmatpush1.bf16.msra.mxu1 %v7016_v51  ;;  %v7108_v49 = vld [vmem:[%s7637_s7 + $0xd2c] ss:$16 sps:$4 sm:$0xff]   ;;  %v7103_v51 = vld [vmem:[%s7637_s7 + $0xd20] ss:$16 sps:$4 sm:$0xff]  }
 0x2d6   : > { %3040 = vmatprep.subr.bf16.mxu0 %v7021_v52  ;;  %3122 = vmatprep.subr.bf16.mxu1 %v7024_v53  ;;  %v7106_v52 = vld [vmem:[%s7637_s7 + $0xd28] ss:$16 sps:$4 sm:$0xff]   ;;  %v7111_v53 = vld [vmem:[%s7637_s7 + $0xd44] ss:$16 sps:$4 sm:$0xff]  }
 0x2d9   : > { %3041 = vmatpush1.bf16.msra.mxu0 %v7019_v54  ;;  %3123 = vmatpush1.bf16.msra.mxu1 %v7022_v56  ;;  %v7114_v54 = vld [vmem:[%s7637_s7 + $0xd4c] ss:$16 sps:$4 sm:$0xff]   ;;  %v7109_v56 = vld [vmem:[%s7637_s7 + $0xd40] ss:$16 sps:$4 sm:$0xff]  }
 0x2da   : > { %3042 = vmatprep.subr.bf16.mxu0 %v7027_v57  ;;  %3124 = vmatprep.subr.bf16.mxu1 %v7030_v58  ;;  %v7112_v57 = vld [vmem:[%s7637_s7 + $0xd48] ss:$16 sps:$4 sm:$0xff]   ;;  %v7117_v58 = vld [vmem:[%s7637_s7 + $0xd64] ss:$16 sps:$4 sm:$0xff]  }
 0x2dd   : > { %3043 = vmatpush1.bf16.msra.mxu0 %v7025_v59  ;;  %3125 = vmatpush1.bf16.msra.mxu1 %v7028_v60  ;;  %v7120_v59 = vld [vmem:[%s7637_s7 + $0xd6c] ss:$16 sps:$4 sm:$0xff]   ;;  %v7115_v60 = vld [vmem:[%s7637_s7 + $0xd60] ss:$16 sps:$4 sm:$0xff]  }
 0x2de   : > { %3044 = vmatprep.subr.bf16.mxu0 %v7033_v61  ;;  %3126 = vmatprep.subr.bf16.mxu1 %v7036_v13  ;;  %v7118_v61 = vld [vmem:[%s7637_s7 + $0xd68] ss:$16 sps:$4 sm:$0xff]   ;;  %v7123_v13 = vld [vmem:[%s7637_s7 + $0xd84] ss:$16 sps:$4 sm:$0xff]  }
 0x2e1   : > { %3045 = vmatpush1.bf16.msra.mxu0 %v7031_v62  ;;  %3127 = vmatpush1.bf16.msra.mxu1 %v7034_v63  ;;  %v7126_v62 = vld [vmem:[%s7637_s7 + $0xd8c] ss:$16 sps:$4 sm:$0xff]   ;;  %v7121_v63 = vld [vmem:[%s7637_s7 + $0xd80] ss:$16 sps:$4 sm:$0xff]  }
 0x2e2   : > { %3046 = vmatprep.subr.bf16.mxu0 %v7039_v0  ;;  %3128 = vmatprep.subr.bf16.mxu1 %v7042_v15  ;;  %v7129_v0 = vld [vmem:[%s7637_s7 + $0xda4] ss:$16 sps:$4 sm:$0xff]   ;;  %v7132_v15 = vld [vmem:[%s7637_s7 + $0xdac] ss:$16 sps:$4 sm:$0xff]  }
 0x2e5   : > { %3047 = vmatpush1.bf16.msra.mxu0 %v7037_v1  ;;  %3129 = vmatpush1.bf16.msra.mxu1 %v7040_v2  ;;  %v7127_v1 = vld [vmem:[%s7637_s7 + $0xda0] ss:$16 sps:$4 sm:$0xff]   ;;  %v7130_v2 = vld [vmem:[%s7637_s7 + $0xda8] ss:$16 sps:$4 sm:$0xff]  }
 0x2e6   : > { %3048 = vmatprep.subr.bf16.mxu0 %v7045_v4  ;;  %3130 = vmatprep.subr.bf16.mxu1 %v7048_v30  ;;  %v7138_v4 = vld [vmem:[%s7637_s7 + $0xdcc] ss:$16 sps:$4 sm:$0xff]   ;;  %v7133_v30 = vld [vmem:[%s7637_s7 + $0xdc0] ss:$16 sps:$4 sm:$0xff]  }
 0x2e9   : > { %3049 = vmatpush1.bf16.msra.mxu0 %v7043_v50  ;;  %3131 = vmatpush1.bf16.msra.mxu1 %v7046_v5  ;;  %v7136_v50 = vld [vmem:[%s7637_s7 + $0xdc8] ss:$16 sps:$4 sm:$0xff]   ;;  %v7141_v5 = vld [vmem:[%s7637_s7 + $0xde4] ss:$16 sps:$4 sm:$0xff]  }
 0x2ea   : > { %3930 = vmatprep.subr.bf16.mxu0 %v7051_v7  ;;  %4012 = vmatprep.subr.bf16.mxu1 %v7054_v8  ;;  %v7139_v7 = vld [vmem:[%s7637_s7 + $0xde0] ss:$16 sps:$4 sm:$0xff]   ;;  %v7142_v8 = vld [vmem:[%s7637_s7 + $0xde8] ss:$16 sps:$4 sm:$0xff]  }
 0x2ec   : > { %3051 = vmatmul.mubr.bf16.vlgmr.msra.gmra.mrb[8].mxu0 %v2190_v10  ;;  %3133 = vmatmul.mubr.bf16.vlgmr.msra.gmra.mrb[8].mxu1 %v2190_v10  ;;  %v8156_v10 = vsub.s32 2, %v7851_v11 }
 0x2ed   : > { %3931 = vmatpush1.bf16.msra.mxu0 %v7049_v55  ;;  %4013 = vmatpush1.bf16.msra.mxu1 %v7052_v9  ;;  %v7147_v55 = vld [vmem:[%s7637_s7 + $0xe04] ss:$16 sps:$4 sm:$0xff]   ;;  %v7150_v9 = vld [vmem:[%s7637_s7 + $0xe0c] ss:$16 sps:$4 sm:$0xff]  }
 0x2ee   : > { %3932 = vmatprep.subr.bf16.mxu0 %v7057_v16  ;;  %4014 = vmatprep.subr.bf16.mxu1 %v7060_v17  ;;  %v8159_v16 = vld [vmem:[%s7857_s10] sm:$0x1f] }
 0x2ef   : > { %v2324_v17 = vrot.slane %v8159_v16, %v8156_v10 }
 0x2f1   : > { %3933 = vmatpush1.bf16.msra.mxu0 %v7055_v18  ;;  %4015 = vmatpush1.bf16.msra.mxu1 %v7058_v19  ;;  %v8164_v18 = vld [vmem:[%s7857_s10 + $0x8] sm:$0x1f] }
 0x2f2   : > { %3934 = vmatprep.subr.bf16.mxu0 %v7063_v21  ;;  %4016 = vmatprep.subr.bf16.mxu1 %v7066_v22  ;;  %v2328_v19 = vrot.slane %v8164_v18, %v8156_v10  ;;  %v8169_v21 = vld [vmem:[%s7857_s10 + $0x18] sm:$0x1f] }
 0x2f3   : > { %v2336_v22 = vrot.slane %v8169_v21, %v8156_v10 }
 0x2f5   : > { %3935 = vmatpush1.bf16.msra.mxu0 %v7061_v23  ;;  %4017 = vmatpush1.bf16.msra.mxu1 %v7064_v24 }
 0x2f6   : > { %3936 = vmatprep.subr.bf16.mxu0 %v7069_v25  ;;  %4018 = vmatprep.subr.bf16.mxu1 %v7072_v26 }
 0x2f9   : > { %3937 = vmatpush1.bf16.msra.mxu0 %v7067_v27  ;;  %4019 = vmatpush1.bf16.msra.mxu1 %v7070_v28 }
 0x2fa   : > { %3938 = vmatprep.subr.bf16.mxu0 %v7075_v29  ;;  %4020 = vmatprep.subr.bf16.mxu1 %v7078_v31 }
 0x2fd   : > { %3939 = vmatpush1.bf16.msra.mxu0 %v7073_v32  ;;  %4021 = vmatpush1.bf16.msra.mxu1 %v7076_v33 }
 0x2fe   : > { %3940 = vmatprep.subr.bf16.mxu0 %v7081_v34  ;;  %4022 = vmatprep.subr.bf16.mxu1 %v7084_v35 }
 0x301   : > { %3941 = vmatpush1.bf16.msra.mxu0 %v7079_v36  ;;  %4023 = vmatpush1.bf16.msra.mxu1 %v7082_v37  ;;  %v7145_v36 = vld [vmem:[%s7637_s7 + $0xe00] ss:$16 sps:$4 sm:$0xff]   ;;  %v7148_v37 = vld [vmem:[%s7637_s7 + $0xe08] ss:$16 sps:$4 sm:$0xff]  }
 0x302   : > { %3942 = vmatprep.subr.bf16.mxu0 %v7087_v38  ;;  %4024 = vmatprep.subr.bf16.mxu1 %v7090_v39  ;;  %v7153_v39 = vld [vmem:[%s7637_s7 + $0xe24] ss:$16 sps:$4 sm:$0xff]  }
 0x305   : > { %3943 = vmatpush1.bf16.msra.mxu0 %v7085_v12  ;;  %4025 = vmatpush1.bf16.msra.mxu1 %v7088_v40  ;;  %v7156_v12 = vld [vmem:[%s7637_s7 + $0xe2c] ss:$16 sps:$4 sm:$0xff]  }
 0x306   : > { %3944 = vmatprep.subr.bf16.mxu0 %v7093_v41  ;;  %4026 = vmatprep.subr.bf16.mxu1 %v7096_v42  ;;  %v7151_v41 = vld [vmem:[%s7637_s7 + $0xe20] ss:$16 sps:$4 sm:$0xff]   ;;  %v7154_v42 = vld [vmem:[%s7637_s7 + $0xe28] ss:$16 sps:$4 sm:$0xff]  }
 0x309   : > { %3945 = vmatpush1.bf16.msra.mxu0 %v7091_v43  ;;  %4027 = vmatpush1.bf16.msra.mxu1 %v7094_v44  ;;  %v7159_v43 = vld [vmem:[%s7637_s7 + $0xe44] ss:$16 sps:$4 sm:$0xff]   ;;  %v7162_v44 = vld [vmem:[%s7637_s7 + $0xe4c] ss:$16 sps:$4 sm:$0xff]  }
 0x30a   : > { %3946 = vmatprep.subr.bf16.mxu0 %v7099_v20  ;;  %4028 = vmatprep.subr.bf16.mxu1 %v7102_v45  ;;  %v7157_v20 = vld [vmem:[%s7637_s7 + $0xe40] ss:$16 sps:$4 sm:$0xff]   ;;  %v7160_v45 = vld [vmem:[%s7637_s7 + $0xe48] ss:$16 sps:$4 sm:$0xff]  }
 0x30d   : > { %3947 = vmatpush1.bf16.msra.mxu0 %v7097_v46  ;;  %4029 = vmatpush1.bf16.msra.mxu1 %v7100_v47  ;;  %v7165_v46 = vld [vmem:[%s7637_s7 + $0xe64] ss:$16 sps:$4 sm:$0xff]   ;;  %v7168_v47 = vld [vmem:[%s7637_s7 + $0xe6c] ss:$16 sps:$4 sm:$0xff]  }
 0x30e   : > { %3948 = vmatprep.subr.bf16.mxu0 %v7105_v48  ;;  %4030 = vmatprep.subr.bf16.mxu1 %v7108_v49  ;;  %v7163_v48 = vld [vmem:[%s7637_s7 + $0xe60] ss:$16 sps:$4 sm:$0xff]   ;;  %v7166_v49 = vld [vmem:[%s7637_s7 + $0xe68] ss:$16 sps:$4 sm:$0xff]  }
 0x311   : > { %3949 = vmatpush1.bf16.msra.mxu0 %v7103_v51  ;;  %4031 = vmatpush1.bf16.msra.mxu1 %v7106_v52  ;;  %v7171_v51 = vld [vmem:[%s7637_s7 + $0xe84] ss:$16 sps:$4 sm:$0xff]   ;;  %v7174_v52 = vld [vmem:[%s7637_s7 + $0xe8c] ss:$16 sps:$4 sm:$0xff]  }
 0x312   : > { %3950 = vmatprep.subr.bf16.mxu0 %v7111_v53  ;;  %4032 = vmatprep.subr.bf16.mxu1 %v7114_v54  ;;  %v7169_v53 = vld [vmem:[%s7637_s7 + $0xe80] ss:$16 sps:$4 sm:$0xff]   ;;  %v7172_v54 = vld [vmem:[%s7637_s7 + $0xe88] ss:$16 sps:$4 sm:$0xff]  }
 0x315   : > { %3951 = vmatpush1.bf16.msra.mxu0 %v7109_v56  ;;  %4033 = vmatpush1.bf16.msra.mxu1 %v7112_v57  ;;  %v7177_v56 = vld [vmem:[%s7637_s7 + $0xea4] ss:$16 sps:$4 sm:$0xff]   ;;  %v7180_v57 = vld [vmem:[%s7637_s7 + $0xeac] ss:$16 sps:$4 sm:$0xff]  }
 0x316   : > { %3952 = vmatprep.subr.bf16.mxu0 %v7117_v58  ;;  %4034 = vmatprep.subr.bf16.mxu1 %v7120_v59  ;;  %v7175_v58 = vld [vmem:[%s7637_s7 + $0xea0] ss:$16 sps:$4 sm:$0xff]   ;;  %v7178_v59 = vld [vmem:[%s7637_s7 + $0xea8] ss:$16 sps:$4 sm:$0xff]  }
 0x319   : > { %3953 = vmatpush1.bf16.msra.mxu0 %v7115_v60  ;;  %4035 = vmatpush1.bf16.msra.mxu1 %v7118_v61  ;;  %v7183_v60 = vld [vmem:[%s7637_s7 + $0xec4] ss:$16 sps:$4 sm:$0xff]   ;;  %v7186_v61 = vld [vmem:[%s7637_s7 + $0xecc] ss:$16 sps:$4 sm:$0xff]  }
 0x31a   : > { %3954 = vmatprep.subr.bf16.mxu0 %v7123_v13  ;;  %4036 = vmatprep.subr.bf16.mxu1 %v7126_v62  ;;  %v7181_v13 = vld [vmem:[%s7637_s7 + $0xec0] ss:$16 sps:$4 sm:$0xff]   ;;  %v7184_v62 = vld [vmem:[%s7637_s7 + $0xec8] ss:$16 sps:$4 sm:$0xff]  }
 0x31d   : > { %3955 = vmatpush1.bf16.msra.mxu0 %v7121_v63  ;;  %4037 = vmatpush1.bf16.msra.mxu1 %v7124_v14  ;;  %v7189_v63 = vld [vmem:[%s7637_s7 + $0xee4] ss:$16 sps:$4 sm:$0xff]   ;;  %v7192_v14 = vld [vmem:[%s7637_s7 + $0xeec] ss:$16 sps:$4 sm:$0xff]  }
 0x31e   : > { %3956 = vmatprep.subr.bf16.mxu0 %v7129_v0  ;;  %4038 = vmatprep.subr.bf16.mxu1 %v7132_v15  ;;  %v7187_v0 = vld [vmem:[%s7637_s7 + $0xee0] ss:$16 sps:$4 sm:$0xff]   ;;  %v7190_v15 = vld [vmem:[%s7637_s7 + $0xee8] ss:$16 sps:$4 sm:$0xff]  }
 0x321   : > { %3957 = vmatpush1.bf16.msra.mxu0 %v7127_v1  ;;  %4039 = vmatpush1.bf16.msra.mxu1 %v7130_v2  ;;  %v7195_v1 = vld [vmem:[%s7637_s7 + $0xf04] ss:$16 sps:$4 sm:$0xff]   ;;  %v7198_v2 = vld [vmem:[%s7637_s7 + $0xf0c] ss:$16 sps:$4 sm:$0xff]  }
 0x322   : > { %3958 = vmatprep.subr.bf16.mxu0 %v7135_v3  ;;  %4040 = vmatprep.subr.bf16.mxu1 %v7138_v4  ;;  %v7193_v3 = vld [vmem:[%s7637_s7 + $0xf00] ss:$16 sps:$4 sm:$0xff]   ;;  %v7196_v4 = vld [vmem:[%s7637_s7 + $0xf08] ss:$16 sps:$4 sm:$0xff]  }
 0x325   : > { %3959 = vmatpush1.bf16.msra.mxu0 %v7133_v30  ;;  %4041 = vmatpush1.bf16.msra.mxu1 %v7136_v50  ;;  %v7201_v30 = vld [vmem:[%s7637_s7 + $0xf24] ss:$16 sps:$4 sm:$0xff]   ;;  %v7204_v50 = vld [vmem:[%s7637_s7 + $0xf2c] ss:$16 sps:$4 sm:$0xff]  }
 0x326   : > { %3960 = vmatprep.subr.bf16.mxu0 %v7141_v5  ;;  %4042 = vmatprep.subr.bf16.mxu1 %v7144_v6  ;;  %v7199_v5 = vld [vmem:[%s7637_s7 + $0xf20] ss:$16 sps:$4 sm:$0xff]   ;;  %v7202_v6 = vld [vmem:[%s7637_s7 + $0xf28] ss:$16 sps:$4 sm:$0xff]  }
 0x329   : > { %3961 = vmatpush1.bf16.msra.mxu0 %v7139_v7  ;;  %4043 = vmatpush1.bf16.msra.mxu1 %v7142_v8  ;;  %v7207_v7 = vld [vmem:[%s7637_s7 + $0xf44] ss:$16 sps:$4 sm:$0xff]   ;;  %v7210_v8 = vld [vmem:[%s7637_s7 + $0xf4c] ss:$16 sps:$4 sm:$0xff]  }
 0x32a   : > { %3971 = vmatprep.subr.bf16.mxu0 %v7147_v55  ;;  %4053 = vmatprep.subr.bf16.mxu1 %v7150_v9  ;;  %v7205_v55 = vld [vmem:[%s7637_s7 + $0xf40] ss:$16 sps:$4 sm:$0xff]   ;;  %v7208_v9 = vld [vmem:[%s7637_s7 + $0xf48] ss:$16 sps:$4 sm:$0xff]  }
 0x3bf   : > { %v3052_v23 = vpop.f32.mrb[8].mxu0  ;;  %v8173_v24 = vpop.f32.mrb[8].mxu1 }
 0x3c0   : > { %v6373_v25 = vadd.f32 %v3052_v23, %v2324_v17  ;;  %v3054_v26 = vpop.f32.mrb[9].mxu0  ;;  %v3136_v27 = vpop.f32.mrb[9].mxu1  ;;  %v7213_v17 = vld [vmem:[%s7637_s7 + $0xf64] ss:$16 sps:$4 sm:$0xff]   ;;  %v7214_v23 = vld [vmem:[%s7637_s7 + $0xf68] ss:$16 sps:$4 sm:$0xff]  }
 0x3c1   : > { %v6374_v28 = vadd.f32 %v3054_v26, %v2328_v19  ;;  %v3056_v29 = vpop.f32.mrb[10].mxu0  ;;  %v3138_v31 = vpop.f32.mrb[10].mxu1  ;;  %v6376_v32 = vadd.f32 %v3136_v27, %v2336_v22  ;;  %v7216_v19 = vld [vmem:[%s7637_s7 + $0xf6c] ss:$16 sps:$4 sm:$0xff]   ;;  %v7211_v22 = vld [vmem:[%s7637_s7 + $0xf60] ss:$16 sps:$4 sm:$0xff]  }
 0x3c2   : > { %v3057_v33 = vpop.f32.mrb[11].mxu0  ;;  %v3139_v34 = vpop.f32.mrb[11].mxu1  ;;  %v3141_v38 = vpack.c.bf16 %v6373_v25, %v6373_v25  ;;  %v7219_v25 = vld [vmem:[%s7637_s7 + $0xf84] ss:$16 sps:$4 sm:$0xff]   ;;  %v7222_v26 = vld [vmem:[%s7637_s7 + $0xf8c] ss:$16 sps:$4 sm:$0xff]  }
 0x3c3   : > { %v3142_v35 = vpack.c.bf16 %v6374_v28, %v6374_v28  ;;  %v3144_v40 = vpack.c.bf16 %v6376_v32, %v6376_v32  ;;  %v7217_v27 = vld [vmem:[%s7637_s7 + $0xf80] ss:$16 sps:$4 sm:$0xff]   ;;  %v7220_v28 = vld [vmem:[%s7637_s7 + $0xf88] ss:$16 sps:$4 sm:$0xff]   ;;  %v7225_v29 = vld [vmem:[%s7637_s7 + $0xfa4] ss:$16 sps:$4 sm:$0xff]  }
 0x3c4   : > { %v7228_v31 = vld [vmem:[%s7637_s7 + $0xfac] ss:$16 sps:$4 sm:$0xff]   ;;  %v7223_v32 = vld [vmem:[%s7637_s7 + $0xfa0] ss:$16 sps:$4 sm:$0xff]   ;;  %v7226_v33 = vld [vmem:[%s7637_s7 + $0xfa8] ss:$16 sps:$4 sm:$0xff]  }
 0x3c5   : > { %3962 = vmatprep.mubr.bf16.mxu0 %v3142_v35  ;;  %4044 = vmatprep.mubr.bf16.mxu1 %v3142_v35  ;;  %v7231_v34 = vld [vmem:[%s7637_s7 + $0xfc4] ss:$16 sps:$4 sm:$0xff]   ;;  %v7234_v35 = vld [vmem:[%s7637_s7 + $0xfcc] ss:$16 sps:$4 sm:$0xff]  }
 0x3c6   : > { %3963 = vmatmul.mubr.bf16.vlgmr.msra.gmra.mrb[12].mxu0 %v3141_v38  ;;  %4045 = vmatmul.mubr.bf16.vlgmr.msra.gmra.mrb[12].mxu1 %v3141_v38  ;;  %v8234_v38 = vld [vmem:[%s7857_s10 + $0x10] sm:$0x1f] }
 0x3c7   : > { %3972 = vmatpush1.bf16.msra.mxu0 %v7145_v36  ;;  %4054 = vmatpush1.bf16.msra.mxu1 %v7148_v37  ;;  %v7229_v36 = vld [vmem:[%s7637_s7 + $0xfc0] ss:$16 sps:$4 sm:$0xff]   ;;  %v7232_v37 = vld [vmem:[%s7637_s7 + $0xfc8] ss:$16 sps:$4 sm:$0xff]  }
 0x3c8   : > { %4003 = vmatprep.mubr.bf16.mxu0 %v3144_v40  ;;  %4085 = vmatprep.mubr.bf16.mxu1 %v3144_v40  ;;  %v7240_v40 = vld [vmem:[%s7637_s7 + $0xfec] ss:$16 sps:$4 sm:$0xff]  }
 0x3c9   : > { %3973 = vmatprep.subr.bf16.mxu0 %v7153_v39  ;;  %4055 = vmatprep.subr.bf16.mxu1 %v7156_v12  ;;  %v2332_v39 = vrot.slane %v8234_v38, %v8156_v10  ;;  %v7237_v12 = vld [vmem:[%s7637_s7 + $0xfe4] ss:$16 sps:$4 sm:$0xff]  }
 0x3ca   : > { %v7246_v10 = vld [vmem:[%s7637_s7 + $0x1204] ss:$16 sps:$4 sm:$0xff]  }
 0x3cb   : > { %3974 = vmatpush1.bf16.msra.mxu0 %v7151_v41  ;;  %4056 = vmatpush1.bf16.msra.mxu1 %v7154_v42  ;;  %v7235_v41 = vld [vmem:[%s7637_s7 + $0xfe0] ss:$16 sps:$4 sm:$0xff]   ;;  %v7238_v42 = vld [vmem:[%s7637_s7 + $0xfe8] ss:$16 sps:$4 sm:$0xff]  }
 0x3cc   : > { %3975 = vmatprep.subr.bf16.mxu0 %v7159_v43  ;;  %4057 = vmatprep.subr.bf16.mxu1 %v7162_v44  ;;  %v6375_v43 = vadd.f32 %v8173_v24, %v2332_v39  ;;  %v7243_v44 = vld [vmem:[%s7637_s7 + $0x1004] ss:$16 sps:$4 sm:$0xff]   ;;  %v7247_v24 = vld [vmem:[%s7637_s7 + $0x1020] ss:$16 sps:$4 sm:$0xff]  }
 0x3cd   : > { %v7321_v39 = vld [vmem:[%s7637_s7 + $0x11a4] ss:$16 sps:$4 sm:$0xff]  }
 0x3cf   : > { %3976 = vmatpush1.bf16.msra.mxu0 %v7157_v20  ;;  %4058 = vmatpush1.bf16.msra.mxu1 %v7160_v45  ;;  %v7241_v20 = vld [vmem:[%s7637_s7 + $0x1000] ss:$16 sps:$4 sm:$0xff]  }
 0x3d0   : > { %3977 = vmatprep.subr.bf16.mxu0 %v7165_v46  ;;  %4059 = vmatprep.subr.bf16.mxu1 %v7168_v47  ;;  %v7244_v45 = vld [vmem:[%s7637_s7 + $0x1200] ss:$16 sps:$4 sm:$0xff]   ;;  %v3143_v46 = vpack.c.bf16 %v6375_v43, %v6375_v43  ;;  %v7249_v47 = vld [vmem:[%s7637_s7 + $0x1024] ss:$16 sps:$4 sm:$0xff]  }
 0x3d1   : > { %v7330_v43 = vld [vmem:[%s7637_s7 + $0x13c4] ss:$16 sps:$4 sm:$0xff]  }
 0x3d3   : > { %3978 = vmatpush1.bf16.msra.mxu0 %v7163_v48  ;;  %4060 = vmatpush1.bf16.msra.mxu1 %v7166_v49  ;;  %v7252_v48 = vld [vmem:[%s7637_s7 + $0x1224] ss:$16 sps:$4 sm:$0xff]   ;;  %v7250_v49 = vld [vmem:[%s7637_s7 + $0x1220] ss:$16 sps:$4 sm:$0xff]  }
 0x3d4   : > { %3979 = vmatprep.subr.bf16.mxu0 %v7171_v51  ;;  %4061 = vmatprep.subr.bf16.mxu1 %v7174_v52  ;;  %v7255_v51 = vld [vmem:[%s7637_s7 + $0x1044] ss:$16 sps:$4 sm:$0xff]  }
 0x3d5   : > { %v7258_v52 = vld [vmem:[%s7637_s7 + $0x1244] ss:$16 sps:$4 sm:$0xff]  }
 0x3d7   : > { %3980 = vmatpush1.bf16.msra.mxu0 %v7169_v53  ;;  %4062 = vmatpush1.bf16.msra.mxu1 %v7172_v54  ;;  %v7253_v53 = vld [vmem:[%s7637_s7 + $0x1040] ss:$16 sps:$4 sm:$0xff]  }
 0x3d8   : > { %3981 = vmatprep.subr.bf16.mxu0 %v7177_v56  ;;  %4063 = vmatprep.subr.bf16.mxu1 %v7180_v57  ;;  %v7256_v54 = vld [vmem:[%s7637_s7 + $0x1240] ss:$16 sps:$4 sm:$0xff]   ;;  %v7261_v56 = vld [vmem:[%s7637_s7 + $0x1064] ss:$16 sps:$4 sm:$0xff]  }
 0x3d9   : > { %v7264_v57 = vld [vmem:[%s7637_s7 + $0x1264] ss:$16 sps:$4 sm:$0xff]  }
 0x3db   : > { %3982 = vmatpush1.bf16.msra.mxu0 %v7175_v58  ;;  %4064 = vmatpush1.bf16.msra.mxu1 %v7178_v59  ;;  %v7259_v58 = vld [vmem:[%s7637_s7 + $0x1060] ss:$16 sps:$4 sm:$0xff]  }
 0x3dc   : > { %3983 = vmatprep.subr.bf16.mxu0 %v7183_v60  ;;  %4065 = vmatprep.subr.bf16.mxu1 %v7186_v61  ;;  %v7262_v59 = vld [vmem:[%s7637_s7 + $0x1260] ss:$16 sps:$4 sm:$0xff]   ;;  %v7267_v60 = vld [vmem:[%s7637_s7 + $0x1084] ss:$16 sps:$4 sm:$0xff]  }
 0x3dd   : > { %v7270_v61 = vld [vmem:[%s7637_s7 + $0x1284] ss:$16 sps:$4 sm:$0xff]  }
 0x3df   : > { %3984 = vmatpush1.bf16.msra.mxu0 %v7181_v13  ;;  %4066 = vmatpush1.bf16.msra.mxu1 %v7184_v62  ;;  %v7265_v13 = vld [vmem:[%s7637_s7 + $0x1080] ss:$16 sps:$4 sm:$0xff]  }
 0x3e0   : > { %3985 = vmatprep.subr.bf16.mxu0 %v7189_v63  ;;  %4067 = vmatprep.subr.bf16.mxu1 %v7192_v14  ;;  %v7268_v62 = vld [vmem:[%s7637_s7 + $0x1280] ss:$16 sps:$4 sm:$0xff]   ;;  %v7273_v63 = vld [vmem:[%s7637_s7 + $0x10a4] ss:$16 sps:$4 sm:$0xff]  }
 0x3e1   : > { %v7276_v14 = vld [vmem:[%s7637_s7 + $0x12a4] ss:$16 sps:$4 sm:$0xff]  }
 0x3e3   : > { %3986 = vmatpush1.bf16.msra.mxu0 %v7187_v0  ;;  %4068 = vmatpush1.bf16.msra.mxu1 %v7190_v15  ;;  %v7271_v0 = vld [vmem:[%s7637_s7 + $0x10a0] ss:$16 sps:$4 sm:$0xff]  }
 0x3e4   : > { %3987 = vmatprep.subr.bf16.mxu0 %v7195_v1  ;;  %4069 = vmatprep.subr.bf16.mxu1 %v7198_v2  ;;  %v7274_v15 = vld [vmem:[%s7637_s7 + $0x12a0] ss:$16 sps:$4 sm:$0xff]   ;;  %v7279_v1 = vld [vmem:[%s7637_s7 + $0x10c4] ss:$16 sps:$4 sm:$0xff]  }
 0x3e5   : > { %v7282_v2 = vld [vmem:[%s7637_s7 + $0x12c4] ss:$16 sps:$4 sm:$0xff]  }
 0x3e7   : > { %3988 = vmatpush1.bf16.msra.mxu0 %v7193_v3  ;;  %4070 = vmatpush1.bf16.msra.mxu1 %v7196_v4  ;;  %v7277_v3 = vld [vmem:[%s7637_s7 + $0x10c0] ss:$16 sps:$4 sm:$0xff]  }
 0x3e8   : > { %3989 = vmatprep.subr.bf16.mxu0 %v7201_v30  ;;  %4071 = vmatprep.subr.bf16.mxu1 %v7204_v50  ;;  %v7280_v4 = vld [vmem:[%s7637_s7 + $0x12c0] ss:$16 sps:$4 sm:$0xff]   ;;  %v7285_v30 = vld [vmem:[%s7637_s7 + $0x10e4] ss:$16 sps:$4 sm:$0xff]  }
 0x3e9   : > { %v7288_v50 = vld [vmem:[%s7637_s7 + $0x12e4] ss:$16 sps:$4 sm:$0xff]  }
 0x3eb   : > { %3990 = vmatpush1.bf16.msra.mxu0 %v7199_v5  ;;  %4072 = vmatpush1.bf16.msra.mxu1 %v7202_v6  ;;  %v7283_v5 = vld [vmem:[%s7637_s7 + $0x10e0] ss:$16 sps:$4 sm:$0xff]  }
 0x3ec   : > { %3991 = vmatprep.subr.bf16.mxu0 %v7207_v7  ;;  %4073 = vmatprep.subr.bf16.mxu1 %v7210_v8  ;;  %v7286_v6 = vld [vmem:[%s7637_s7 + $0x12e0] ss:$16 sps:$4 sm:$0xff]   ;;  %v7291_v7 = vld [vmem:[%s7637_s7 + $0x1104] ss:$16 sps:$4 sm:$0xff]  }
 0x3ed   : > { %v7294_v8 = vld [vmem:[%s7637_s7 + $0x1304] ss:$16 sps:$4 sm:$0xff]  }
 0x3ef   : > { %3992 = vmatpush1.bf16.msra.mxu0 %v7205_v55  ;;  %4074 = vmatpush1.bf16.msra.mxu1 %v7208_v9  ;;  %v7289_v55 = vld [vmem:[%s7637_s7 + $0x1100] ss:$16 sps:$4 sm:$0xff]  }
 0x3f0   : > { %3993 = vmatprep.subr.bf16.mxu0 %v7213_v17  ;;  %4075 = vmatprep.subr.bf16.mxu1 %v7216_v19  ;;  %v7292_v9 = vld [vmem:[%s7637_s7 + $0x1300] ss:$16 sps:$4 sm:$0xff]   ;;  %v7297_v17 = vld [vmem:[%s7637_s7 + $0x1124] ss:$16 sps:$4 sm:$0xff]  }
 0x3f1   : > { %v7300_v19 = vld [vmem:[%s7637_s7 + $0x1324] ss:$16 sps:$4 sm:$0xff]  }
 0x3f3   : > { %3994 = vmatpush1.bf16.msra.mxu0 %v7211_v22  ;;  %4076 = vmatpush1.bf16.msra.mxu1 %v7214_v23  ;;  %v7295_v22 = vld [vmem:[%s7637_s7 + $0x1120] ss:$16 sps:$4 sm:$0xff]  }
 0x3f4   : > { %3995 = vmatprep.subr.bf16.mxu0 %v7219_v25  ;;  %4077 = vmatprep.subr.bf16.mxu1 %v7222_v26  ;;  %v7298_v23 = vld [vmem:[%s7637_s7 + $0x1320] ss:$16 sps:$4 sm:$0xff]   ;;  %v7303_v25 = vld [vmem:[%s7637_s7 + $0x1144] ss:$16 sps:$4 sm:$0xff]  }
 0x3f5   : > { %v7306_v26 = vld [vmem:[%s7637_s7 + $0x1344] ss:$16 sps:$4 sm:$0xff]  }
 0x3f7   : > { %3996 = vmatpush1.bf16.msra.mxu0 %v7217_v27  ;;  %4078 = vmatpush1.bf16.msra.mxu1 %v7220_v28  ;;  %v7301_v27 = vld [vmem:[%s7637_s7 + $0x1140] ss:$16 sps:$4 sm:$0xff]  }
 0x3f8   : > { %3997 = vmatprep.subr.bf16.mxu0 %v7225_v29  ;;  %4079 = vmatprep.subr.bf16.mxu1 %v7228_v31  ;;  %v7304_v28 = vld [vmem:[%s7637_s7 + $0x1340] ss:$16 sps:$4 sm:$0xff]   ;;  %v7309_v29 = vld [vmem:[%s7637_s7 + $0x1164] ss:$16 sps:$4 sm:$0xff]  }
 0x3f9   : > { %v7312_v31 = vld [vmem:[%s7637_s7 + $0x1364] ss:$16 sps:$4 sm:$0xff]  }
 0x3fb   : > { %3998 = vmatpush1.bf16.msra.mxu0 %v7223_v32  ;;  %4080 = vmatpush1.bf16.msra.mxu1 %v7226_v33  ;;  %v7307_v32 = vld [vmem:[%s7637_s7 + $0x1160] ss:$16 sps:$4 sm:$0xff]  }
 0x3fc   : > { %3999 = vmatprep.subr.bf16.mxu0 %v7231_v34  ;;  %4081 = vmatprep.subr.bf16.mxu1 %v7234_v35  ;;  %v7310_v33 = vld [vmem:[%s7637_s7 + $0x1360] ss:$16 sps:$4 sm:$0xff]   ;;  %v7315_v34 = vld [vmem:[%s7637_s7 + $0x1184] ss:$16 sps:$4 sm:$0xff]  }
 0x3fd   : > { %v7318_v35 = vld [vmem:[%s7637_s7 + $0x1384] ss:$16 sps:$4 sm:$0xff]  }
 0x3ff   : > { %4000 = vmatpush1.bf16.msra.mxu0 %v7229_v36  ;;  %4082 = vmatpush1.bf16.msra.mxu1 %v7232_v37  ;;  %v7313_v36 = vld [vmem:[%s7637_s7 + $0x1180] ss:$16 sps:$4 sm:$0xff]  }
 0x400   : > { %4001 = vmatprep.subr.bf16.mxu0 %v7237_v12  ;;  %4083 = vmatprep.subr.bf16.mxu1 %v7240_v40  ;;  %v7316_v37 = vld [vmem:[%s7637_s7 + $0x1380] ss:$16 sps:$4 sm:$0xff]   ;;  %v7324_v12 = vld [vmem:[%s7637_s7 + $0x13a4] ss:$16 sps:$4 sm:$0xff]  }
 0x401   : > { %v7319_v40 = vld [vmem:[%s7637_s7 + $0x11a0] ss:$16 sps:$4 sm:$0xff]  }
 0x403   : > { %4002 = vmatpush1.bf16.msra.mxu0 %v7235_v41  ;;  %4084 = vmatpush1.bf16.msra.mxu1 %v7238_v42  ;;  %v7322_v41 = vld [vmem:[%s7637_s7 + $0x13a0] ss:$16 sps:$4 sm:$0xff]   ;;  %v7327_v42 = vld [vmem:[%s7637_s7 + $0x11c4] ss:$16 sps:$4 sm:$0xff]  }
 0x404   : > { %4887 = vmatprep.subr.bf16.mxu0 %v7243_v44  ;;  %4928 = vmatprep.subr.bf16.mxu1 %v7246_v10  ;;  %v7325_v44 = vld [vmem:[%s7637_s7 + $0x11c0] ss:$16 sps:$4 sm:$0xff]  }
 0x405   : > { %v7328_v10 = vld [vmem:[%s7637_s7 + $0x13c0] ss:$16 sps:$4 sm:$0xff]  }
 0x406   : > { %4004 = vmatmul.mubr.bf16.vlgmr.msra.gmra.mrb[12].mxu0 %v3143_v46  ;;  %4086 = vmatmul.mubr.bf16.vlgmr.msra.gmra.mrb[12].mxu1 %v3143_v46  ;;  %v7331_v46 = vld [vmem:[%s7637_s7 + $0x11e0] ss:$16 sps:$4 sm:$0xff]  }
 0x407   : > { %4888 = vmatpush1.bf16.msra.mxu0 %v7241_v20  ;;  %4929 = vmatpush1.bf16.msra.mxu1 %v7244_v45  ;;  %v7333_v20 = vld [vmem:[%s7637_s7 + $0x11e4] ss:$16 sps:$4 sm:$0xff]  }
 0x408   : > { %4889 = vmatprep.subr.bf16.mxu0 %v7249_v47  ;;  %4930 = vmatprep.subr.bf16.mxu1 %v7252_v48  ;;  %v7336_v45 = vld [vmem:[%s7637_s7 + $0x13e4] ss:$16 sps:$4 sm:$0xff]   ;;  %v7334_v47 = vld [vmem:[%s7637_s7 + $0x13e0] ss:$16 sps:$4 sm:$0xff]   ;;  %v7339_v48 = vld [vmem:[%s7637_s7 + $0x100c] ss:$16 sps:$4 sm:$0xff]  }
 0x40b   : > { %4890 = vmatpush1.bf16.msra.mxu0 %v7247_v24  ;;  %4931 = vmatpush1.bf16.msra.mxu1 %v7250_v49  ;;  %v7342_v24 = vld [vmem:[%s7637_s7 + $0x120c] ss:$16 sps:$4 sm:$0xff]   ;;  %v3276_v49 = vsub.s32 3, %v7851_v11 }
 0x40c   : > { %4891 = vmatprep.subr.bf16.mxu0 %v7255_v51  ;;  %4932 = vmatprep.subr.bf16.mxu1 %v7258_v52 }
 0x40d   : > { %v3277_v51 = vrot.slane %v8159_v16, %v3276_v49  ;;  %v3285_v52 = vrot.slane %v8234_v38, %v3276_v49 }
 0x40f   : > { %4892 = vmatpush1.bf16.msra.mxu0 %v7253_v53  ;;  %4933 = vmatpush1.bf16.msra.mxu1 %v7256_v54  ;;  %v3281_v53 = vrot.slane %v8164_v18, %v3276_v49  ;;  %v3289_v54 = vrot.slane %v8169_v21, %v3276_v49  ;;  %v7393_v49 = vld [vmem:[%s7637_s7 + $0x112c] ss:$16 sps:$4 sm:$0xff]  }
 0x410   : > { %4893 = vmatprep.subr.bf16.mxu0 %v7261_v56  ;;  %4934 = vmatprep.subr.bf16.mxu1 %v7264_v57 }
 0x413   : > { %4894 = vmatpush1.bf16.msra.mxu0 %v7259_v58  ;;  %4935 = vmatpush1.bf16.msra.mxu1 %v7262_v59 }
 0x414   : > { %4895 = vmatprep.subr.bf16.mxu0 %v7267_v60  ;;  %4936 = vmatprep.subr.bf16.mxu1 %v7270_v61 }
 0x417   : > { %4896 = vmatpush1.bf16.msra.mxu0 %v7265_v13  ;;  %4937 = vmatpush1.bf16.msra.mxu1 %v7268_v62 }
 0x418   : > { %4897 = vmatprep.subr.bf16.mxu0 %v7273_v63  ;;  %4938 = vmatprep.subr.bf16.mxu1 %v7276_v14 }
 0x41b   : > { %4898 = vmatpush1.bf16.msra.mxu0 %v7271_v0  ;;  %4939 = vmatpush1.bf16.msra.mxu1 %v7274_v15 }
 0x41c   : > { %4899 = vmatprep.subr.bf16.mxu0 %v7279_v1  ;;  %4940 = vmatprep.subr.bf16.mxu1 %v7282_v2 }
 0x41f   : > { %4900 = vmatpush1.bf16.msra.mxu0 %v7277_v3  ;;  %4941 = vmatpush1.bf16.msra.mxu1 %v7280_v4 }
 0x420   : > { %4901 = vmatprep.subr.bf16.mxu0 %v7285_v30  ;;  %4942 = vmatprep.subr.bf16.mxu1 %v7288_v50 }
 0x423   : > { %4902 = vmatpush1.bf16.msra.mxu0 %v7283_v5  ;;  %4943 = vmatpush1.bf16.msra.mxu1 %v7286_v6  ;;  %v7337_v5 = vld [vmem:[%s7637_s7 + $0x1008] ss:$16 sps:$4 sm:$0xff]  }
 0x424   : > { %4903 = vmatprep.subr.bf16.mxu0 %v7291_v7  ;;  %4944 = vmatprep.subr.bf16.mxu1 %v7294_v8  ;;  %v7340_v6 = vld [vmem:[%s7637_s7 + $0x1208] ss:$16 sps:$4 sm:$0xff]  }
 0x427   : > { %4904 = vmatpush1.bf16.msra.mxu0 %v7289_v55  ;;  %4945 = vmatpush1.bf16.msra.mxu1 %v7292_v9  ;;  %v7345_v55 = vld [vmem:[%s7637_s7 + $0x102c] ss:$16 sps:$4 sm:$0xff]  }
 0x428   : > { %4905 = vmatprep.subr.bf16.mxu0 %v7297_v17  ;;  %4946 = vmatprep.subr.bf16.mxu1 %v7300_v19  ;;  %v7348_v9 = vld [vmem:[%s7637_s7 + $0x122c] ss:$16 sps:$4 sm:$0xff]   ;;  %v7343_v17 = vld [vmem:[%s7637_s7 + $0x1028] ss:$16 sps:$4 sm:$0xff]  }
 0x429   : > { %v7346_v19 = vld [vmem:[%s7637_s7 + $0x1228] ss:$16 sps:$4 sm:$0xff]  }
 0x42b   : > { %4906 = vmatpush1.bf16.msra.mxu0 %v7295_v22  ;;  %4947 = vmatpush1.bf16.msra.mxu1 %v7298_v23  ;;  %v7351_v22 = vld [vmem:[%s7637_s7 + $0x104c] ss:$16 sps:$4 sm:$0xff]  }
 0x42c   : > { %4907 = vmatprep.subr.bf16.mxu0 %v7303_v25  ;;  %4948 = vmatprep.subr.bf16.mxu1 %v7306_v26  ;;  %v7354_v23 = vld [vmem:[%s7637_s7 + $0x124c] ss:$16 sps:$4 sm:$0xff]   ;;  %v7349_v25 = vld [vmem:[%s7637_s7 + $0x1048] ss:$16 sps:$4 sm:$0xff]  }
 0x42d   : > { %v7352_v26 = vld [vmem:[%s7637_s7 + $0x1248] ss:$16 sps:$4 sm:$0xff]  }
 0x42f   : > { %4908 = vmatpush1.bf16.msra.mxu0 %v7301_v27  ;;  %4949 = vmatpush1.bf16.msra.mxu1 %v7304_v28  ;;  %v7357_v27 = vld [vmem:[%s7637_s7 + $0x106c] ss:$16 sps:$4 sm:$0xff]  }
 0x430   : > { %4909 = vmatprep.subr.bf16.mxu0 %v7309_v29  ;;  %4950 = vmatprep.subr.bf16.mxu1 %v7312_v31  ;;  %v7360_v28 = vld [vmem:[%s7637_s7 + $0x126c] ss:$16 sps:$4 sm:$0xff]   ;;  %v7355_v29 = vld [vmem:[%s7637_s7 + $0x1068] ss:$16 sps:$4 sm:$0xff]  }
 0x431   : > { %v7358_v31 = vld [vmem:[%s7637_s7 + $0x1268] ss:$16 sps:$4 sm:$0xff]  }
 0x433   : > { %4910 = vmatpush1.bf16.msra.mxu0 %v7307_v32  ;;  %4951 = vmatpush1.bf16.msra.mxu1 %v7310_v33  ;;  %v7363_v32 = vld [vmem:[%s7637_s7 + $0x108c] ss:$16 sps:$4 sm:$0xff]  }
 0x434   : > { %4911 = vmatprep.subr.bf16.mxu0 %v7315_v34  ;;  %4952 = vmatprep.subr.bf16.mxu1 %v7318_v35  ;;  %v7366_v33 = vld [vmem:[%s7637_s7 + $0x128c] ss:$16 sps:$4 sm:$0xff]   ;;  %v7361_v34 = vld [vmem:[%s7637_s7 + $0x1088] ss:$16 sps:$4 sm:$0xff]  }
 0x435   : > { %v7364_v35 = vld [vmem:[%s7637_s7 + $0x1288] ss:$16 sps:$4 sm:$0xff]  }
 0x437   : > { %4912 = vmatpush1.bf16.msra.mxu0 %v7313_v36  ;;  %4953 = vmatpush1.bf16.msra.mxu1 %v7316_v37  ;;  %v7369_v36 = vld [vmem:[%s7637_s7 + $0x10ac] ss:$16 sps:$4 sm:$0xff]  }
 0x438   : > { %4913 = vmatprep.subr.bf16.mxu0 %v7321_v39  ;;  %4954 = vmatprep.subr.bf16.mxu1 %v7324_v12  ;;  %v7372_v37 = vld [vmem:[%s7637_s7 + $0x12ac] ss:$16 sps:$4 sm:$0xff]   ;;  %v7367_v39 = vld [vmem:[%s7637_s7 + $0x10a8] ss:$16 sps:$4 sm:$0xff]  }
 0x439   : > { %v7370_v12 = vld [vmem:[%s7637_s7 + $0x12a8] ss:$16 sps:$4 sm:$0xff]  }
 0x43b   : > { %4914 = vmatpush1.bf16.msra.mxu0 %v7319_v40  ;;  %4955 = vmatpush1.bf16.msra.mxu1 %v7322_v41  ;;  %v7375_v40 = vld [vmem:[%s7637_s7 + $0x10cc] ss:$16 sps:$4 sm:$0xff]  }
 0x43c   : > { %4915 = vmatprep.subr.bf16.mxu0 %v7327_v42  ;;  %4956 = vmatprep.subr.bf16.mxu1 %v7330_v43  ;;  %v7378_v41 = vld [vmem:[%s7637_s7 + $0x12cc] ss:$16 sps:$4 sm:$0xff]   ;;  %v7373_v42 = vld [vmem:[%s7637_s7 + $0x10c8] ss:$16 sps:$4 sm:$0xff]  }
 0x43d   : > { %v7376_v43 = vld [vmem:[%s7637_s7 + $0x12c8] ss:$16 sps:$4 sm:$0xff]  }
 0x43f   : > { %4916 = vmatpush1.bf16.msra.mxu0 %v7325_v44  ;;  %4957 = vmatpush1.bf16.msra.mxu1 %v7328_v10  ;;  %v7381_v44 = vld [vmem:[%s7637_s7 + $0x10ec] ss:$16 sps:$4 sm:$0xff]  }
 0x440   : > { %4917 = vmatprep.subr.bf16.mxu0 %v7333_v20  ;;  %4958 = vmatprep.subr.bf16.mxu1 %v7336_v45  ;;  %v7384_v10 = vld [vmem:[%s7637_s7 + $0x12ec] ss:$16 sps:$4 sm:$0xff]   ;;  %v7379_v20 = vld [vmem:[%s7637_s7 + $0x10e8] ss:$16 sps:$4 sm:$0xff]  }
 0x441   : > { %v7382_v45 = vld [vmem:[%s7637_s7 + $0x12e8] ss:$16 sps:$4 sm:$0xff]  }
 0x443   : > { %4918 = vmatpush1.bf16.msra.mxu0 %v7331_v46  ;;  %4959 = vmatpush1.bf16.msra.mxu1 %v7334_v47  ;;  %v7387_v46 = vld [vmem:[%s7637_s7 + $0x110c] ss:$16 sps:$4 sm:$0xff]  }
 0x444   : > { %4969 = vmatprep.subr.bf16.mxu0 %v7339_v48  ;;  %5010 = vmatprep.subr.bf16.mxu1 %v7342_v24  ;;  %v7390_v47 = vld [vmem:[%s7637_s7 + $0x130c] ss:$16 sps:$4 sm:$0xff]   ;;  %v7385_v48 = vld [vmem:[%s7637_s7 + $0x1108] ss:$16 sps:$4 sm:$0xff]  }
 0x445   : > { %v7388_v24 = vld [vmem:[%s7637_s7 + $0x1308] ss:$16 sps:$4 sm:$0xff]  }
 0x4d9   : > { %v4005_v56 = vpop.f32.mrb[12].mxu0  ;;  %v4087_v57 = vpop.f32.mrb[12].mxu1 }
 0x4da   : > { %v6377_v58 = vadd.f32 %v4005_v56, %v3277_v51  ;;  %v6379_v59 = vadd.f32 %v4087_v57, %v3285_v52  ;;  %v4007_v60 = vpop.f32.mrb[13].mxu0  ;;  %v4089_v61 = vpop.f32.mrb[13].mxu1  ;;  %v7396_v51 = vld [vmem:[%s7637_s7 + $0x132c] ss:$16 sps:$4 sm:$0xff]   ;;  %v7391_v52 = vld [vmem:[%s7637_s7 + $0x1128] ss:$16 sps:$4 sm:$0xff]  }
 0x4db   : > { %v6378_v13 = vadd.f32 %v4007_v60, %v3281_v53  ;;  %v6380_v62 = vadd.f32 %v4089_v61, %v3289_v54  ;;  %v4009_v63 = vpop.f32.mrb[14].mxu0  ;;  %v4091_v14 = vpop.f32.mrb[14].mxu1  ;;  %v7394_v53 = vld [vmem:[%s7637_s7 + $0x1328] ss:$16 sps:$4 sm:$0xff]   ;;  %v7399_v54 = vld [vmem:[%s7637_s7 + $0x114c] ss:$16 sps:$4 sm:$0xff]  }
 0x4dc   : > { %v4094_v0 = vmax.f32 %v6377_v58, 0.0  ;;  %v4096_v15 = vmax.f32 %v6379_v59, 0.0  ;;  %v4010_v1 = vpop.f32.mrb[15].mxu0  ;;  %v4092_v2 = vpop.f32.mrb[15].mxu1  ;;  %v7402_v56 = vld [vmem:[%s7637_s7 + $0x134c] ss:$16 sps:$4 sm:$0xff]  }
 0x4dd   : > { %v4095_v3 = vmax.f32 %v6378_v13, 0.0  ;;  %v4097_v4 = vmax.f32 %v6380_v62, 0.0  ;;  %v7397_v57 = vld [vmem:[%s7637_s7 + $0x1148] ss:$16 sps:$4 sm:$0xff]   ;;  %v7405_v59 = vld [vmem:[%s7637_s7 + $0x116c] ss:$16 sps:$4 sm:$0xff]  }
 0x4de   : > { %v8316_v7 = vpack.c.bf16 %v4094_v0, %v4094_v0  ;;  %v8318_v8 = vpack.c.bf16 %v4096_v15, %v4096_v15  ;;  %v7400_v58 = vld [vmem:[%s7637_s7 + $0x1348] ss:$16 sps:$4 sm:$0xff]   ;;  %v7408_v60 = vld [vmem:[%s7637_s7 + $0x136c] ss:$16 sps:$4 sm:$0xff]  }
 0x4df   : > { %v4099_v30 = vpack.c.bf16 %v4095_v3, %v4095_v3  ;;  %v4101_v50 = vpack.c.bf16 %v4097_v4, %v4097_v4  ;;  %v7403_v61 = vld [vmem:[%s7637_s7 + $0x1168] ss:$16 sps:$4 sm:$0xff]   ;;  %v7411_v62 = vld [vmem:[%s7637_s7 + $0x118c] ss:$16 sps:$4 sm:$0xff]  }
 0x4e0   : > { %v7406_v13 = vld [vmem:[%s7637_s7 + $0x1368] ss:$16 sps:$4 sm:$0xff]   ;;  %v7414_v63 = vld [vmem:[%s7637_s7 + $0x138c] ss:$16 sps:$4 sm:$0xff]  }
 0x4e1   : > { %4919 = vmatprep.mubr.bf16.mxu0 %v4099_v30  ;;  %4960 = vmatprep.mubr.bf16.mxu1 %v4101_v50  ;;  %v7409_v14 = vld [vmem:[%s7637_s7 + $0x1188] ss:$16 sps:$4 sm:$0xff]   ;;  %v7417_v15 = vld [vmem:[%s7637_s7 + $0x11ac] ss:$16 sps:$4 sm:$0xff]  }
 0x4e2   : > { %4920 = vmatmul.mubr.bf16.vlgmr.msra.gmra.mrb[16].mxu0 %v8316_v7  ;;  %4961 = vmatmul.mubr.bf16.vlgmr.msra.gmra.mrb[16].mxu1 %v8318_v8  ;;  %v7412_v0 = vld [vmem:[%s7637_s7 + $0x1388] ss:$16 sps:$4 sm:$0xff]   ;;  %v7420_v1 = vld [vmem:[%s7637_s7 + $0x13ac] ss:$16 sps:$4 sm:$0xff]  }
 0x4e3   : > { %4970 = vmatpush1.bf16.msra.mxu0 %v7337_v5  ;;  %5011 = vmatpush1.bf16.msra.mxu1 %v7340_v6  ;;  %v7415_v2 = vld [vmem:[%s7637_s7 + $0x11a8] ss:$16 sps:$4 sm:$0xff]   ;;  %v7423_v4 = vld [vmem:[%s7637_s7 + $0x11cc] ss:$16 sps:$4 sm:$0xff]  }
 0x4e4   : > { %5001 = vmatprep.mubr.bf16.mxu0 %v4099_v30  ;;  %5042 = vmatprep.mubr.bf16.mxu1 %v4101_v50  ;;  %v7418_v3 = vld [vmem:[%s7637_s7 + $0x13a8] ss:$16 sps:$4 sm:$0xff]   ;;  %v7426_v30 = vld [vmem:[%s7637_s7 + $0x13cc] ss:$16 sps:$4 sm:$0xff]  }
 0x4e5   : > { %4971 = vmatprep.subr.bf16.mxu0 %v7345_v55  ;;  %5012 = vmatprep.subr.bf16.mxu1 %v7348_v9  ;;  %v7421_v50 = vld [vmem:[%s7637_s7 + $0x11c8] ss:$16 sps:$4 sm:$0xff]   ;;  %v7429_v6 = vld [vmem:[%s7637_s7 + $0x11ec] ss:$16 sps:$4 sm:$0xff]  }
 0x4e6   : > { %v7424_v5 = vld [vmem:[%s7637_s7 + $0x13c8] ss:$16 sps:$4 sm:$0xff]   ;;  %v7432_v55 = vld [vmem:[%s7637_s7 + $0x13ec] ss:$16 sps:$4 sm:$0xff]  }
 0x4e7   : > { %4972 = vmatpush1.bf16.msra.mxu0 %v7343_v17  ;;  %5013 = vmatpush1.bf16.msra.mxu1 %v7346_v19  ;;  %v7427_v9 = vld [vmem:[%s7637_s7 + $0x11e8] ss:$16 sps:$4 sm:$0xff]   ;;  %v4233_v19 = vsub.s32 4, %v7851_v11 }
 0x4e8   : > { %4973 = vmatprep.subr.bf16.mxu0 %v7351_v22  ;;  %5014 = vmatprep.subr.bf16.mxu1 %v7354_v23  ;;  %v7430_v17 = vld [vmem:[%s7637_s7 + $0x13e8] ss:$16 sps:$4 sm:$0xff]   ;;  %v5055_v23 = vstv %s5053_s12 }
 0x4e9   : > { %v4234_v22 = vrot.slane %v8159_v16, %v4233_v19 }
 0x4eb   : > { %4974 = vmatpush1.bf16.msra.mxu0 %v7349_v25  ;;  %5015 = vmatpush1.bf16.msra.mxu1 %v7352_v26  ;;  %v4238_v25 = vrot.slane %v8164_v18, %v4233_v19 }
 0x4ec   : > { %4975 = vmatprep.subr.bf16.mxu0 %v7357_v27  ;;  %5016 = vmatprep.subr.bf16.mxu1 %v7360_v28 }
 0x4ef   : > { %4976 = vmatpush1.bf16.msra.mxu0 %v7355_v29  ;;  %5017 = vmatpush1.bf16.msra.mxu1 %v7358_v31  ;;  %v7437_v29 = vld [vmem:[%s7695_s6] sm:$0xff] }
 0x4f0   : > { %4977 = vmatprep.subr.bf16.mxu0 %v7363_v32  ;;  %5018 = vmatprep.subr.bf16.mxu1 %v7366_v33  ;;  %v5056_v31 = vmul.f32 %v7437_v29, %v5055_v23  ;;  %v7438_v33 = vld [vmem:[%s7695_s6 + $0x8] sm:$0xff] }
 0x4f3   : > { %4978 = vmatpush1.bf16.msra.mxu0 %v7361_v34  ;;  %5019 = vmatpush1.bf16.msra.mxu1 %v7364_v35 }
 0x4f4   : > { %4979 = vmatprep.subr.bf16.mxu0 %v7369_v36  ;;  %5020 = vmatprep.subr.bf16.mxu1 %v7372_v37 }
 0x4f7   : > { %4980 = vmatpush1.bf16.msra.mxu0 %v7367_v39  ;;  %5021 = vmatpush1.bf16.msra.mxu1 %v7370_v12 }
 0x4f8   : > { %4981 = vmatprep.subr.bf16.mxu0 %v7375_v40  ;;  %5022 = vmatprep.subr.bf16.mxu1 %v7378_v41  ;;  %v4242_v40 = vrot.slane %v8234_v38, %v4233_v19  ;;  %v4246_v41 = vrot.slane %v8169_v21, %v4233_v19 }
 0x4fb   : > { %4982 = vmatpush1.bf16.msra.mxu0 %v7373_v42  ;;  %5023 = vmatpush1.bf16.msra.mxu1 %v7376_v43 }
 0x4fc   : > { %4983 = vmatprep.subr.bf16.mxu0 %v7381_v44  ;;  %5024 = vmatprep.subr.bf16.mxu1 %v7384_v10  ;;  %v7439_v10 = vld [vmem:[%s7695_s6 + $0x10] sm:$0xff] }
 0x4ff   : > { %4984 = vmatpush1.bf16.msra.mxu0 %v7379_v20  ;;  %5025 = vmatpush1.bf16.msra.mxu1 %v7382_v45  ;;  %v5058_v20 = vmul.f32 %v7439_v10, %v5055_v23 }
 0x500   : > { %4985 = vmatprep.subr.bf16.mxu0 %v7387_v46  ;;  %5026 = vmatprep.subr.bf16.mxu1 %v7390_v47 }
 0x503   : > { %4986 = vmatpush1.bf16.msra.mxu0 %v7385_v48  ;;  %5027 = vmatpush1.bf16.msra.mxu1 %v7388_v24  ;;  %v7440_v48 = vld [vmem:[%s7695_s6 + $0x18] sm:$0xff] }
 0x504   : > { %4987 = vmatprep.subr.bf16.mxu0 %v7393_v49  ;;  %5028 = vmatprep.subr.bf16.mxu1 %v7396_v51  ;;  %v5059_v24 = vmul.f32 %v7440_v48, %v5055_v23 }
 0x507   : > { %4988 = vmatpush1.bf16.msra.mxu0 %v7391_v52  ;;  %5029 = vmatpush1.bf16.msra.mxu1 %v7394_v53 }
 0x508   : > { %4989 = vmatprep.subr.bf16.mxu0 %v7399_v54  ;;  %5030 = vmatprep.subr.bf16.mxu1 %v7402_v56 }
 0x50b   : > { %4990 = vmatpush1.bf16.msra.mxu0 %v7397_v57  ;;  %5031 = vmatpush1.bf16.msra.mxu1 %v7400_v58 }
 0x50c   : > { %4991 = vmatprep.subr.bf16.mxu0 %v7405_v59  ;;  %5032 = vmatprep.subr.bf16.mxu1 %v7408_v60 }
 0x50f   : > { %4992 = vmatpush1.bf16.msra.mxu0 %v7403_v61  ;;  %5033 = vmatpush1.bf16.msra.mxu1 %v7406_v13 }
 0x510   : > { %4993 = vmatprep.subr.bf16.mxu0 %v7411_v62  ;;  %5034 = vmatprep.subr.bf16.mxu1 %v7414_v63 }
 0x513   : > { %4994 = vmatpush1.bf16.msra.mxu0 %v7409_v14  ;;  %5035 = vmatpush1.bf16.msra.mxu1 %v7412_v0 }
 0x514   : > { %4995 = vmatprep.subr.bf16.mxu0 %v7417_v15  ;;  %5036 = vmatprep.subr.bf16.mxu1 %v7420_v1 }
 0x517   : > { %4996 = vmatpush1.bf16.msra.mxu0 %v7415_v2  ;;  %5037 = vmatpush1.bf16.msra.mxu1 %v7418_v3 }
 0x518   : > { %4997 = vmatprep.subr.bf16.mxu0 %v7423_v4  ;;  %5038 = vmatprep.subr.bf16.mxu1 %v7426_v30 }
 0x51b   : > { %4998 = vmatpush1.bf16.msra.mxu0 %v7421_v50  ;;  %5039 = vmatpush1.bf16.msra.mxu1 %v7424_v5 }
 0x51c   : > { %4999 = vmatprep.subr.bf16.mxu0 %v7429_v6  ;;  %5040 = vmatprep.subr.bf16.mxu1 %v7432_v55 }
 0x51f   : > { %5000 = vmatpush1.bf16.msra.mxu0 %v7427_v9  ;;  %5041 = vmatpush1.bf16.msra.mxu1 %v7430_v17 }
 0x522   : > { %5002 = vmatmul.mubr.bf16.vlgmr.msra.gmra.mrb[20].mxu0 %v8316_v7  ;;  %5043 = vmatmul.mubr.bf16.vlgmr.msra.gmra.mrb[20].mxu1 %v8318_v8  ;;  %v5057_v8 = vmul.f32 %v7438_v33, %v5055_v23 }
 0x5b5   : > { %v4921_v26 = vpop.f32.mrb[16].mxu0  ;;  %v4962_v27 = vpop.f32.mrb[16].mxu1 }
 0x5b6   : > { %v4922_v28 = vadd.f32 %v4921_v26, %v4234_v22  ;;  %v4923_v7 = vpop.f32.mrb[17].mxu0  ;;  %v4964_v32 = vpop.f32.mrb[17].mxu1 }
 0x5b7   : > { %v4924_v34 = vadd.f32 %v4923_v7, %v4238_v25  ;;  %v4925_v35 = vpop.f32.mrb[18].mxu0  ;;  %v4966_v11 = vpop.f32.mrb[18].mxu1 }
 0x5b8   : > { %v4963_v36 = vadd.f32 %v4962_v27, %v4922_v28  ;;  %v4926_v37 = vpop.f32.mrb[19].mxu0  ;;  %v4967_v16 = vpop.f32.mrb[19].mxu1 }
 0x5b9   : > { %v4965_v18 = vadd.f32 %v4964_v32, %v4924_v34 }
 0x5ba   : > { %v5060_v39 = vadd.f32 %v5056_v31, %v4963_v36 }
 0x5bb   : > { %v5061_v12 = vadd.f32 %v5057_v8, %v4965_v18 }
 0x5bc   : > { %5064 = vst [vmem:[%s266_s20] sm:$0xff] %v5060_v39 }
 0x5bd   : > { %5065 = vst [vmem:[%s266_s20 + $0x8] sm:$0xff] %v5061_v12 }
 0x5f5   : > { %v5003_v42 = vpop.f32.mrb[20].mxu0  ;;  %v5044_v43 = vpop.f32.mrb[20].mxu1 }
 0x5f6   : > { %v5004_v44 = vadd.f32 %v5003_v42, %v4242_v40  ;;  %v5005_v45 = vpop.f32.mrb[21].mxu0  ;;  %v5046_v46 = vpop.f32.mrb[21].mxu1 }
 0x5f7   : > { %v5006_v47 = vadd.f32 %v5005_v45, %v4246_v41  ;;  %v5007_v49 = vpop.f32.mrb[22].mxu0  ;;  %v5048_v51 = vpop.f32.mrb[22].mxu1 }
 0x5f8   : > { %v5045_v52 = vadd.f32 %v5044_v43, %v5004_v44  ;;  %v5008_v53 = vpop.f32.mrb[23].mxu0  ;;  %v5049_v54 = vpop.f32.mrb[23].mxu1 }
 0x5f9   : > { %v5047_v56 = vadd.f32 %v5046_v46, %v5006_v47 }
 0x5fa   : > { %v5062_v57 = vadd.f32 %v5058_v20, %v5045_v52 }
 0x5fb   : > { %v5063_v38 = vadd.f32 %v5059_v24, %v5047_v56 }
 0x5fc   : > { %5066 = vst [vmem:[%s266_s20 + $0x10] sm:$0xff] %v5062_v57 }
 0x5fd   : > { %5067 = vst [vmem:[%s266_s20 + $0x18] sm:$0xff] %v5063_v38 }
 0x5fe PF: > { %s16_s17 = sadd.s32 1, %s7521_s17   ;;  %s8422_s12 = smov %s7505_s13 }
 0x5ff   : > { %p13_p4 = scmp.ge.s32.totalorder %s16_s17, 4   ;;  %s8423_s13 = smov %s7509_s14 }
 0x600   : > { %s8424_s14 = smov %s7591_s23  ;;  %s8425_s15 = smov %s7517_s16 }
 0x601   : > { %s8426_s16 = smov %s8428_s19  ;;  %15 = sbr.rel (!%p13_p4) target bundleno = 4 (0x4), region = 82 }
 0x608   :  { %5097 = vsyncpa [#allocation3], 1 }
 0x609   :  { %5099 = vsyncpa [#allocation3 + $0x1], 1 }

</bundles_post_ra>
